<compile_context>
chip_gen: v6e
topology: v6e:2x2x1
jax: 0.10.0
libtpu: 0.0.40
codegen_flags: <defaults>
</compile_context>

<pallas_src>
import numpy as np
import jax
import jax.numpy as jnp
from jax.experimental import pallas as pl
from jax.experimental.pallas import tpu as pltpu

INPUT_SIZE = 1
HIDDEN = 32
NUM_LAYERS = 2            # hard-wired: two stacked LSTM layers inside the kernel
OUT_FEATURES = 12
HEAD_PAD = 128            # merged policy+value head padded to a full lane width

# bf16 MXU inputs with f32 accumulation (single-pass MXU on all generations).
# Use jnp.float32 here if bit-exactness vs. an f32 reference is required.
MXU_INPUT_DTYPE = jnp.bfloat16


def lstm_kernel(x_ref, len_ref, wih0_ref, b0_ref, whhblk_ref, wih1_ref, b1_ref,
                whead_ref, bhead_ref, head_ref):
    B, T, _ = x_ref.shape
    G = b0_ref.shape[-1]          # 4H
    H = G // 4
    H2 = 2 * H

    lens = len_ref[...]                       # (B, 1) int32
    whh_blk = whhblk_ref[...]                 # (2H, 8H) block-diag, pre-scaled, MXU dtype
    wih1 = wih1_ref[...]                      # (H, 4H)  pre-scaled, MXU dtype
    b1 = b1_ref[...]                          # (1, 4H)  f32, pre-scaled

    # Per-gate-lane affine constants (built once in the preamble):
    #   sigmoid lanes (i/f/o): act = 0.5*tanh(g_scaled) + 0.5   (0.5 pre-scale is in the weights)
    #   tanh lanes (g):        act = 1.0*tanh(g_scaled) + 0.0
    lane = jax.lax.broadcasted_iota(jnp.int32, (1, G), 1)
    is_g_gate = (lane >= 2 * H) & (lane < 3 * H)
    post_a = jnp.where(is_g_gate, 1.0, 0.5).astype(jnp.float32)
    post_b = jnp.where(is_g_gate, 0.0, 0.5).astype(jnp.float32)

    # Layer-0 input term for all steps: one lane-dense broadcast FMA
    # (input_size == 1, wih0/b0 already carry the gate pre-scale and b_ih0+b_hh0).
    xg = x_ref[...] * wih0_ref[...] + b0_ref[...]          # (B, T, 4H) f32

    def cell(g_scaled, c_prev):
        # single full-width tanh for all four gates, then one per-lane FMA
        act = post_a * jnp.tanh(g_scaled) + post_b          # (B, 4H)
        i = act[:, 0 * H:1 * H]
        f = act[:, 1 * H:2 * H]
        gg = act[:, 2 * H:3 * H]
        o = act[:, 3 * H:4 * H]
        c_new = f * c_prev + i * gg
        h_new = o * jnp.tanh(c_new)
        return h_new, c_new

    # Fused recurrent state: [h_layer0 | h_layer1], [c_layer0 | c_layer1].
    h_cat = jnp.zeros((B, H2), jnp.float32)
    c_cat = jnp.zeros((B, H2), jnp.float32)

    # Fully unrolled recurrence: T is small and compile-time constant.
    # (If T ever grows beyond ~16-32, switch to lax.fori_loop(..., unroll=4).)
    for t in range(T):
        mask = (t < lens)                                   # (B, 1) packed-seq mask

        # One fused 256-wide recurrent matmul covering both layers.
        g_rec = jnp.dot(h_cat.astype(MXU_INPUT_DTYPE), whh_blk,
                        preferred_element_type=jnp.float32)            # (B, 8H)

        # layer 0
        g0 = xg[:, t, :] + g_rec[:, :G]
        h0n, c0n = cell(g0, c_cat[:, :H])

        # layer 1 (input = layer-0 new hidden)
        g1 = (jnp.dot(h0n.astype(MXU_INPUT_DTYPE), wih1,
                      preferred_element_type=jnp.float32)
              + g_rec[:, G:] + b1)
        h1n, c1n = cell(g1, c_cat[:, H:])

        # Only advance state while t < lengths[b] (pack_padded_sequence semantics):
        # 2 fused selects on (B, 2H) instead of 4 on (B, H).
        h_new = jnp.concatenate([h0n, h1n], axis=1)
        c_new = jnp.concatenate([c0n, c1n], axis=1)
        h_cat = jnp.where(mask, h_new, h_cat)
        c_cat = jnp.where(mask, c_new, c_cat)

    # Merged policy/value head: single MXU push, lane-dense unmasked (B,128) store.
    head_ref[...] = (jnp.dot(h_cat[:, H:].astype(MXU_INPUT_DTYPE), whead_ref[...],
                             preferred_element_type=jnp.float32)
                     + bhead_ref[...])


def init_params(key):
    """Deterministic init mirroring PyTorch's U(-1/sqrt(H), 1/sqrt(H))."""
    k = 1.0 / float(HIDDEN) ** 0.5
    keys = jax.random.split(key, 12)

    def u(kk, shape):
        return jax.random.uniform(kk, shape, jnp.float32, -k, k)

    return dict(
        # stored pre-transposed relative to PyTorch: (in, 4H) instead of (4H, in)
        wih0=u(keys[0], (INPUT_SIZE, 4 * HIDDEN)),
        whh0=u(keys[1], (HIDDEN, 4 * HIDDEN)),
        b0=u(keys[2], (1, 4 * HIDDEN)) + u(keys[3], (1, 4 * HIDDEN)),   # b_ih_l0 + b_hh_l0
        wih1=u(keys[4], (HIDDEN, 4 * HIDDEN)),
        whh1=u(keys[5], (HIDDEN, 4 * HIDDEN)),
        b1=u(keys[6], (1, 4 * HIDDEN)) + u(keys[7], (1, 4 * HIDDEN)),   # b_ih_l1 + b_hh_l1
        wp=u(keys[8], (HIDDEN, OUT_FEATURES)),
        bp=u(keys[9], (1, OUT_FEATURES)),
        wv=u(keys[10], (HIDDEN, 1)),
        bv=u(keys[11], (1, 1)),
    )


def prepare_params(params):
    """One-time weight preprocessing (runs at init, never per call):
       * fold the sigmoid 0.5 pre-scale into every gate weight/bias column,
       * build the block-diagonal fused recurrent weight diag(Whh0, Whh1),
       * merge + lane-pad the policy/value head,
       * pre-cast the MXU operands to MXU_INPUT_DTYPE."""
    H = HIDDEN
    G = 4 * H

    # gate order [i, f, g, o]: sigmoid lanes get the 0.5 pre-scale, tanh (g) lanes 1.0
    col_scale = jnp.asarray(
        np.concatenate([np.full(H, 0.5), np.full(H, 0.5),
                        np.full(H, 1.0), np.full(H, 0.5)]).astype(np.float32))[None, :]

    wih0 = params["wih0"] * col_scale          # (1, 4H)
    b0 = params["b0"] * col_scale              # (1, 4H)
    b1 = params["b1"] * col_scale              # (1, 4H)
    wih1 = params["wih1"] * col_scale          # (H, 4H)

    # Block-diagonal fused recurrent weight (2H, 8H) = diag(Whh0, Whh1), pre-scaled.
    # (On v5e's 128-wide MXU two separate pushes would be marginally better; the
    #  block-diag fusion targets the 256-wide v6e/v7x MXU.)
    Z = jnp.zeros((H, G), jnp.float32)
    whh_blk = jnp.concatenate(
        [jnp.concatenate([params["whh0"] * col_scale, Z], axis=1),
         jnp.concatenate([Z, params["whh1"] * col_scale], axis=1)], axis=0)

    # Merged, lane-padded policy/value head: columns [0:12]=policy, [12]=value.
    whead = jnp.zeros((H, HEAD_PAD), jnp.float32)
    whead = whead.at[:, :OUT_FEATURES].set(params["wp"])
    whead = whead.at[:, OUT_FEATURES:OUT_FEATURES + 1].set(params["wv"])
    bhead = jnp.zeros((1, HEAD_PAD), jnp.float32)
    bhead = bhead.at[:, :OUT_FEATURES].set(params["bp"])
    bhead = bhead.at[:, OUT_FEATURES:OUT_FEATURES + 1].set(params["bv"])

    return dict(
        wih0=wih0.astype(jnp.float32),                 # stays f32 (VPU FMA in preamble)
        b0=b0.astype(jnp.float32),
        whh_blk=whh_blk.astype(MXU_INPUT_DTYPE),       # MXU operands pre-cast once
        wih1=wih1.astype(MXU_INPUT_DTYPE),
        b1=b1.astype(jnp.float32),
        whead=whead.astype(MXU_INPUT_DTYPE),
        bhead=bhead.astype(jnp.float32),
    )


@jax.jit
def lstm_forward(prep, x, lengths):
    """x: (B, T, input_size) float; lengths: (B,) int -> (policy (B,12), value (B,1))."""
    B, T, _ = x.shape
    lens2d = lengths.astype(jnp.int32).reshape(B, 1)

    vmem = pl.BlockSpec(memory_space=pltpu.MemorySpace.VMEM)
    # NOTE: at larger batch sizes, add a leading batch grid axis with
    # compiler_params=pltpu.CompilerParams(dimension_semantics=("parallel",)) so both
    # v7x TensorCores run independent sequence chains (pad per-core batch to a sublane
    # multiple); at B=2 a grid-less single invocation is optimal.
    head = pl.pallas_call(
        lstm_kernel,
        out_shape=jax.ShapeDtypeStruct((B, HEAD_PAD), jnp.float32),
        in_specs=[vmem] * 9,
        out_specs=vmem,
    )(x.astype(jnp.float32), lens2d,
      prep["wih0"], prep["b0"], prep["whh_blk"], prep["wih1"], prep["b1"],
      prep["whead"], prep["bhead"])

    policy = head[:, :OUT_FEATURES]
    value = head[:, OUT_FEATURES:OUT_FEATURES + 1]
    return policy, value


def lstm_reference(params, x, lengths):
    """Pure-JAX reference of the PyTorch module (f32 throughout, unscaled weights)."""
    B, T, _ = x.shape
    H = HIDDEN
    x = x.astype(jnp.float32)
    lens2d = lengths.astype(jnp.int32).reshape(B, 1)

    def cell(g, c_prev):
        i = jax.nn.sigmoid(g[:, :H])
        f = jax.nn.sigmoid(g[:, H:2 * H])
        gg = jnp.tanh(g[:, 2 * H:3 * H])
        o = jax.nn.sigmoid(g[:, 3 * H:])
        c = f * c_prev + i * gg
        return o * jnp.tanh(c), c

    h0 = c0 = h1 = c1 = jnp.zeros((B, H), jnp.float32)
    for t in range(T):
        mask = (t < lens2d)
        xt = x[:, t, :]
        g0 = xt @ params["wih0"] + h0 @ params["whh0"] + params["b0"]
        h0n, c0n = cell(g0, c0)
        g1 = h0n @ params["wih1"] + h1 @ params["whh1"] + params["b1"]
        h1n, c1n = cell(g1, c1)
        h0 = jnp.where(mask, h0n, h0)
        c0 = jnp.where(mask, c0n, c0)
        h1 = jnp.where(mask, h1n, h1)
        c1 = jnp.where(mask, c1n, c1)

    policy = h1 @ params["wp"] + params["bp"]
    value = h1 @ params["wv"] + params["bv"]
    return policy, value


if __name__ == "__main__":
    key = jax.random.PRNGKey(0)
    pkey, xkey = jax.random.split(key)
    params = init_params(pkey)
    prep = prepare_params(params)            # one-time preprocessing, not per call

    B, T = 2, 8
    x = jax.random.normal(xkey, (B, T, INPUT_SIZE), jnp.float32)
    lengths = jnp.array([8, 5], dtype=jnp.int32)   # variable-length (padded) sequences

    policy, value = lstm_forward(prep, x, lengths)
    jax.block_until_ready((policy, value))

    assert policy.shape == (B, OUT_FEATURES)
    assert value.shape == (B, 1)

    # Sanity check vs. pure-JAX f32 reference (loose tol covers bf16 MXU inputs).
    p_ref, v_ref = lstm_reference(params, x, lengths)
    np.testing.assert_allclose(np.asarray(policy), np.asarray(p_ref), atol=1e-1, rtol=1e-1)
    np.testing.assert_allclose(np.asarray(value), np.asarray(v_ref), atol=1e-1, rtol=1e-1)

    print("KERNEL_OK")
</pallas_src>

<mosaic_0001>
module attributes {stable_mosaic.version = 11 : i64} {
  func.func @lstm_kernel(%arg0: memref<2x8x1xf32, #tpu.memory_space<vmem>>, %arg1: memref<2x1xi32, #tpu.memory_space<vmem>>, %arg2: memref<1x128xf32, #tpu.memory_space<vmem>>, %arg3: memref<1x128xf32, #tpu.memory_space<vmem>>, %arg4: memref<64x256xbf16, #tpu.memory_space<vmem>>, %arg5: memref<32x128xbf16, #tpu.memory_space<vmem>>, %arg6: memref<1x128xf32, #tpu.memory_space<vmem>>, %arg7: memref<32x128xbf16, #tpu.memory_space<vmem>>, %arg8: memref<1x128xf32, #tpu.memory_space<vmem>>, %arg9: memref<2x128xf32, #tpu.memory_space<vmem>>) attributes {dimension_semantics = [], scalar_prefetch = 0 : i64, scratch_operands = 0 : i64, tpu.core_type = #tpu.core_type<tc>} {
    %c0 = arith.constant 0 : index
    %c0_0 = arith.constant 0 : index
    %0 = vector.load %arg1[%c0, %c0_0] : memref<2x1xi32, #tpu.memory_space<vmem>>, vector<2x1xi32>
    %c0_1 = arith.constant 0 : index
    %c0_2 = arith.constant 0 : index
    %1 = vector.load %arg4[%c0_1, %c0_2] : memref<64x256xbf16, #tpu.memory_space<vmem>>, vector<64x256xbf16>
    %c0_3 = arith.constant 0 : index
    %c0_4 = arith.constant 0 : index
    %2 = vector.load %arg5[%c0_3, %c0_4] : memref<32x128xbf16, #tpu.memory_space<vmem>>, vector<32x128xbf16>
    %c0_5 = arith.constant 0 : index
    %c0_6 = arith.constant 0 : index
    %3 = vector.load %arg6[%c0_5, %c0_6] : memref<1x128xf32, #tpu.memory_space<vmem>>, vector<1x128xf32>
    %4 = tpu.iota {dimensions = array<i32: 1>} : vector<1x128xi32>
    %c64_i32 = arith.constant 64 : i32
    %5 = vector.broadcast %c64_i32 : i32 to vector<1x128xi32>
    %6 = arith.cmpi sge, %4, %5 : vector<1x128xi32>
    %c96_i32 = arith.constant 96 : i32
    %7 = vector.broadcast %c96_i32 : i32 to vector<1x128xi32>
    %8 = arith.cmpi slt, %4, %7 : vector<1x128xi32>
    %9 = arith.andi %6, %8 : vector<1x128xi1>
    %cst = arith.constant 1.000000e+00 : f32
    %cst_7 = arith.constant 5.000000e-01 : f32
    %10 = vector.broadcast %cst : f32 to vector<1x128xf32>
    %11 = vector.broadcast %cst_7 : f32 to vector<1x128xf32>
    %12 = arith.select %9, %10, %11 : vector<1x128xi1>, vector<1x128xf32>
    %cst_8 = arith.constant 0.000000e+00 : f32
    %cst_9 = arith.constant 5.000000e-01 : f32
    %13 = vector.broadcast %cst_8 : f32 to vector<1x128xf32>
    %14 = vector.broadcast %cst_9 : f32 to vector<1x128xf32>
    %15 = arith.select %9, %13, %14 : vector<1x128xi1>, vector<1x128xf32>
    %c0_10 = arith.constant 0 : index
    %c0_11 = arith.constant 0 : index
    %c0_12 = arith.constant 0 : index
    %16 = vector.load %arg0[%c0_10, %c0_11, %c0_12] : memref<2x8x1xf32, #tpu.memory_space<vmem>>, vector<2x8x1xf32>
    %c0_13 = arith.constant 0 : index
    %c0_14 = arith.constant 0 : index
    %17 = vector.load %arg2[%c0_13, %c0_14] : memref<1x128xf32, #tpu.memory_space<vmem>>, vector<1x128xf32>
    %18 = vector.shape_cast %17 : vector<1x128xf32> to vector<1x1x128xf32>
    %19 = vector.broadcast %16 : vector<2x8x1xf32> to vector<2x8x128xf32>
    %20 = vector.broadcast %18 : vector<1x1x128xf32> to vector<2x8x128xf32>
    %21 = arith.mulf %19, %20 : vector<2x8x128xf32>
    %c0_15 = arith.constant 0 : index
    %c0_16 = arith.constant 0 : index
    %22 = vector.load %arg3[%c0_15, %c0_16] : memref<1x128xf32, #tpu.memory_space<vmem>>, vector<1x128xf32>
    %23 = vector.shape_cast %22 : vector<1x128xf32> to vector<1x1x128xf32>
    %24 = vector.broadcast %23 : vector<1x1x128xf32> to vector<2x8x128xf32>
    %25 = arith.addf %21, %24 : vector<2x8x128xf32>
    %cst_17 = arith.constant 0.000000e+00 : f32
    %26 = vector.broadcast %cst_17 : f32 to vector<2x64xf32>
    %cst_18 = arith.constant 0.000000e+00 : f32
    %27 = vector.broadcast %cst_18 : f32 to vector<2x64xf32>
    %c0_i32 = arith.constant 0 : i32
    %28 = vector.broadcast %c0_i32 : i32 to vector<2x1xi32>
    %29 = arith.cmpi sgt, %0, %28 : vector<2x1xi32>
    %30 = arith.truncf %26 : vector<2x64xf32> to vector<2x64xbf16>
    %cst_19 = arith.constant dense<0.000000e+00> : vector<2x256xf32>
    %31 = tpu.matmul %30, %1, %cst_19 {dimension_numbers = #tpu.dot_dimension_numbers<[1], [0], [0], [1], [0, 0, 1, 1], [], []>} : vector<2x64xbf16>, vector<64x256xbf16>, vector<2x256xf32> -> vector<2x256xf32>
    %32 = vector.extract_strided_slice %25 {offsets = [0, 0, 0], sizes = [2, 1, 128], strides = [1, 1, 1]} : vector<2x8x128xf32> to vector<2x1x128xf32>
    %33 = vector.shape_cast %32 : vector<2x1x128xf32> to vector<2x128xf32>
    %34 = vector.extract_strided_slice %31 {offsets = [0, 0], sizes = [2, 128], strides = [1, 1]} : vector<2x256xf32> to vector<2x128xf32>
    %35 = arith.addf %33, %34 : vector<2x128xf32>
    %36 = vector.extract_strided_slice %27 {offsets = [0, 0], sizes = [2, 32], strides = [1, 1]} : vector<2x64xf32> to vector<2x32xf32>
    %37 = math.tanh %35 : vector<2x128xf32>
    %38 = vector.broadcast %12 : vector<1x128xf32> to vector<2x128xf32>
    %39 = arith.mulf %38, %37 : vector<2x128xf32>
    %40 = vector.broadcast %15 : vector<1x128xf32> to vector<2x128xf32>
    %41 = arith.addf %39, %40 : vector<2x128xf32>
    %42 = vector.extract_strided_slice %41 {offsets = [0, 0], sizes = [2, 32], strides = [1, 1]} : vector<2x128xf32> to vector<2x32xf32>
    %43 = vector.extract_strided_slice %41 {offsets = [0, 32], sizes = [2, 32], strides = [1, 1]} : vector<2x128xf32> to vector<2x32xf32>
    %44 = vector.extract_strided_slice %41 {offsets = [0, 64], sizes = [2, 32], strides = [1, 1]} : vector<2x128xf32> to vector<2x32xf32>
    %45 = vector.extract_strided_slice %41 {offsets = [0, 96], sizes = [2, 32], strides = [1, 1]} : vector<2x128xf32> to vector<2x32xf32>
    %46 = arith.mulf %43, %36 : vector<2x32xf32>
    %47 = arith.mulf %42, %44 : vector<2x32xf32>
    %48 = arith.addf %46, %47 : vector<2x32xf32>
    %49 = math.tanh %48 : vector<2x32xf32>
    %50 = arith.mulf %45, %49 : vector<2x32xf32>
    %51 = arith.truncf %50 : vector<2x32xf32> to vector<2x32xbf16>
    %cst_20 = arith.constant dense<0.000000e+00> : vector<2x128xf32>
    %52 = tpu.matmul %51, %2, %cst_20 {dimension_numbers = #tpu.dot_dimension_numbers<[1], [0], [0], [1], [0, 0, 1, 1], [], []>} : vector<2x32xbf16>, vector<32x128xbf16>, vector<2x128xf32> -> vector<2x128xf32>
    %53 = vector.extract_strided_slice %31 {offsets = [0, 128], sizes = [2, 128], strides = [1, 1]} : vector<2x256xf32> to vector<2x128xf32>
    %54 = arith.addf %52, %53 : vector<2x128xf32>
    %55 = vector.broadcast %3 : vector<1x128xf32> to vector<2x128xf32>
    %56 = arith.addf %54, %55 : vector<2x128xf32>
    %57 = vector.extract_strided_slice %27 {offsets = [0, 32], sizes = [2, 32], strides = [1, 1]} : vector<2x64xf32> to vector<2x32xf32>
    %58 = math.tanh %56 : vector<2x128xf32>
    %59 = vector.broadcast %12 : vector<1x128xf32> to vector<2x128xf32>
    %60 = arith.mulf %59, %58 : vector<2x128xf32>
    %61 = vector.broadcast %15 : vector<1x128xf32> to vector<2x128xf32>
    %62 = arith.addf %60, %61 : vector<2x128xf32>
    %63 = vector.extract_strided_slice %62 {offsets = [0, 0], sizes = [2, 32], strides = [1, 1]} : vector<2x128xf32> to vector<2x32xf32>
    %64 = vector.extract_strided_slice %62 {offsets = [0, 32], sizes = [2, 32], strides = [1, 1]} : vector<2x128xf32> to vector<2x32xf32>
    %65 = vector.extract_strided_slice %62 {offsets = [0, 64], sizes = [2, 32], strides = [1, 1]} : vector<2x128xf32> to vector<2x32xf32>
    %66 = vector.extract_strided_slice %62 {offsets = [0, 96], sizes = [2, 32], strides = [1, 1]} : vector<2x128xf32> to vector<2x32xf32>
    %67 = arith.mulf %64, %57 : vector<2x32xf32>
    %68 = arith.mulf %63, %65 : vector<2x32xf32>
    %69 = arith.addf %67, %68 : vector<2x32xf32>
    %70 = math.tanh %69 : vector<2x32xf32>
    %71 = arith.mulf %66, %70 : vector<2x32xf32>
    %72 = tpu.concatenate %50, %71 in 1 : vector<2x32xf32>, vector<2x32xf32> -> vector<2x64xf32>
    %73 = tpu.concatenate %48, %69 in 1 : vector<2x32xf32>, vector<2x32xf32> -> vector<2x64xf32>
    %74 = vector.shape_cast %29 : vector<2x1xi1> to vector<2x1xi1>
    %75 = vector.broadcast %74 : vector<2x1xi1> to vector<2x64xi1>
    %76 = arith.select %75, %72, %26 : vector<2x64xi1>, vector<2x64xf32>
    %77 = vector.shape_cast %29 : vector<2x1xi1> to vector<2x1xi1>
    %78 = vector.broadcast %77 : vector<2x1xi1> to vector<2x64xi1>
    %79 = arith.select %78, %73, %27 : vector<2x64xi1>, vector<2x64xf32>
    %c1_i32 = arith.constant 1 : i32
    %80 = vector.broadcast %c1_i32 : i32 to vector<2x1xi32>
    %81 = arith.cmpi sgt, %0, %80 : vector<2x1xi32>
    %82 = arith.truncf %76 : vector<2x64xf32> to vector<2x64xbf16>
    %cst_21 = arith.constant dense<0.000000e+00> : vector<2x256xf32>
    %83 = tpu.matmul %82, %1, %cst_21 {dimension_numbers = #tpu.dot_dimension_numbers<[1], [0], [0], [1], [0, 0, 1, 1], [], []>} : vector<2x64xbf16>, vector<64x256xbf16>, vector<2x256xf32> -> vector<2x256xf32>
    %84 = vector.extract_strided_slice %25 {offsets = [0, 1, 0], sizes = [2, 1, 128], strides = [1, 1, 1]} : vector<2x8x128xf32> to vector<2x1x128xf32>
    %85 = vector.shape_cast %84 : vector<2x1x128xf32> to vector<2x128xf32>
    %86 = vector.extract_strided_slice %83 {offsets = [0, 0], sizes = [2, 128], strides = [1, 1]} : vector<2x256xf32> to vector<2x128xf32>
    %87 = arith.addf %85, %86 : vector<2x128xf32>
    %88 = vector.extract_strided_slice %79 {offsets = [0, 0], sizes = [2, 32], strides = [1, 1]} : vector<2x64xf32> to vector<2x32xf32>
    %89 = math.tanh %87 : vector<2x128xf32>
    %90 = vector.broadcast %12 : vector<1x128xf32> to vector<2x128xf32>
    %91 = arith.mulf %90, %89 : vector<2x128xf32>
    %92 = vector.broadcast %15 : vector<1x128xf32> to vector<2x128xf32>
    %93 = arith.addf %91, %92 : vector<2x128xf32>
    %94 = vector.extract_strided_slice %93 {offsets = [0, 0], sizes = [2, 32], strides = [1, 1]} : vector<2x128xf32> to vector<2x32xf32>
    %95 = vector.extract_strided_slice %93 {offsets = [0, 32], sizes = [2, 32], strides = [1, 1]} : vector<2x128xf32> to vector<2x32xf32>
    %96 = vector.extract_strided_slice %93 {offsets = [0, 64], sizes = [2, 32], strides = [1, 1]} : vector<2x128xf32> to vector<2x32xf32>
    %97 = vector.extract_strided_slice %93 {offsets = [0, 96], sizes = [2, 32], strides = [1, 1]} : vector<2x128xf32> to vector<2x32xf32>
    %98 = arith.mulf %95, %88 : vector<2x32xf32>
    %99 = arith.mulf %94, %96 : vector<2x32xf32>
    %100 = arith.addf %98, %99 : vector<2x32xf32>
    %101 = math.tanh %100 : vector<2x32xf32>
    %102 = arith.mulf %97, %101 : vector<2x32xf32>
    %103 = arith.truncf %102 : vector<2x32xf32> to vector<2x32xbf16>
    %cst_22 = arith.constant dense<0.000000e+00> : vector<2x128xf32>
    %104 = tpu.matmul %103, %2, %cst_22 {dimension_numbers = #tpu.dot_dimension_numbers<[1], [0], [0], [1], [0, 0, 1, 1], [], []>} : vector<2x32xbf16>, vector<32x128xbf16>, vector<2x128xf32> -> vector<2x128xf32>
    %105 = vector.extract_strided_slice %83 {offsets = [0, 128], sizes = [2, 128], strides = [1, 1]} : vector<2x256xf32> to vector<2x128xf32>
    %106 = arith.addf %104, %105 : vector<2x128xf32>
    %107 = vector.broadcast %3 : vector<1x128xf32> to vector<2x128xf32>
    %108 = arith.addf %106, %107 : vector<2x128xf32>
    %109 = vector.extract_strided_slice %79 {offsets = [0, 32], sizes = [2, 32], strides = [1, 1]} : vector<2x64xf32> to vector<2x32xf32>
    %110 = math.tanh %108 : vector<2x128xf32>
    %111 = vector.broadcast %12 : vector<1x128xf32> to vector<2x128xf32>
    %112 = arith.mulf %111, %110 : vector<2x128xf32>
    %113 = vector.broadcast %15 : vector<1x128xf32> to vector<2x128xf32>
    %114 = arith.addf %112, %113 : vector<2x128xf32>
    %115 = vector.extract_strided_slice %114 {offsets = [0, 0], sizes = [2, 32], strides = [1, 1]} : vector<2x128xf32> to vector<2x32xf32>
    %116 = vector.extract_strided_slice %114 {offsets = [0, 32], sizes = [2, 32], strides = [1, 1]} : vector<2x128xf32> to vector<2x32xf32>
    %117 = vector.extract_strided_slice %114 {offsets = [0, 64], sizes = [2, 32], strides = [1, 1]} : vector<2x128xf32> to vector<2x32xf32>
    %118 = vector.extract_strided_slice %114 {offsets = [0, 96], sizes = [2, 32], strides = [1, 1]} : vector<2x128xf32> to vector<2x32xf32>
    %119 = arith.mulf %116, %109 : vector<2x32xf32>
    %120 = arith.mulf %115, %117 : vector<2x32xf32>
    %121 = arith.addf %119, %120 : vector<2x32xf32>
    %122 = math.tanh %121 : vector<2x32xf32>
    %123 = arith.mulf %118, %122 : vector<2x32xf32>
    %124 = tpu.concatenate %102, %123 in 1 : vector<2x32xf32>, vector<2x32xf32> -> vector<2x64xf32>
    %125 = tpu.concatenate %100, %121 in 1 : vector<2x32xf32>, vector<2x32xf32> -> vector<2x64xf32>
    %126 = vector.shape_cast %81 : vector<2x1xi1> to vector<2x1xi1>
    %127 = vector.broadcast %126 : vector<2x1xi1> to vector<2x64xi1>
    %128 = arith.select %127, %124, %76 : vector<2x64xi1>, vector<2x64xf32>
    %129 = vector.shape_cast %81 : vector<2x1xi1> to vector<2x1xi1>
    %130 = vector.broadcast %129 : vector<2x1xi1> to vector<2x64xi1>
    %131 = arith.select %130, %125, %79 : vector<2x64xi1>, vector<2x64xf32>
    %c2_i32 = arith.constant 2 : i32
    %132 = vector.broadcast %c2_i32 : i32 to vector<2x1xi32>
    %133 = arith.cmpi sgt, %0, %132 : vector<2x1xi32>
    %134 = arith.truncf %128 : vector<2x64xf32> to vector<2x64xbf16>
    %cst_23 = arith.constant dense<0.000000e+00> : vector<2x256xf32>
    %135 = tpu.matmul %134, %1, %cst_23 {dimension_numbers = #tpu.dot_dimension_numbers<[1], [0], [0], [1], [0, 0, 1, 1], [], []>} : vector<2x64xbf16>, vector<64x256xbf16>, vector<2x256xf32> -> vector<2x256xf32>
    %136 = vector.extract_strided_slice %25 {offsets = [0, 2, 0], sizes = [2, 1, 128], strides = [1, 1, 1]} : vector<2x8x128xf32> to vector<2x1x128xf32>
    %137 = vector.shape_cast %136 : vector<2x1x128xf32> to vector<2x128xf32>
    %138 = vector.extract_strided_slice %135 {offsets = [0, 0], sizes = [2, 128], strides = [1, 1]} : vector<2x256xf32> to vector<2x128xf32>
    %139 = arith.addf %137, %138 : vector<2x128xf32>
    %140 = vector.extract_strided_slice %131 {offsets = [0, 0], sizes = [2, 32], strides = [1, 1]} : vector<2x64xf32> to vector<2x32xf32>
    %141 = math.tanh %139 : vector<2x128xf32>
    %142 = vector.broadcast %12 : vector<1x128xf32> to vector<2x128xf32>
    %143 = arith.mulf %142, %141 : vector<2x128xf32>
    %144 = vector.broadcast %15 : vector<1x128xf32> to vector<2x128xf32>
    %145 = arith.addf %143, %144 : vector<2x128xf32>
    %146 = vector.extract_strided_slice %145 {offsets = [0, 0], sizes = [2, 32], strides = [1, 1]} : vector<2x128xf32> to vector<2x32xf32>
    %147 = vector.extract_strided_slice %145 {offsets = [0, 32], sizes = [2, 32], strides = [1, 1]} : vector<2x128xf32> to vector<2x32xf32>
    %148 = vector.extract_strided_slice %145 {offsets = [0, 64], sizes = [2, 32], strides = [1, 1]} : vector<2x128xf32> to vector<2x32xf32>
    %149 = vector.extract_strided_slice %145 {offsets = [0, 96], sizes = [2, 32], strides = [1, 1]} : vector<2x128xf32> to vector<2x32xf32>
    %150 = arith.mulf %147, %140 : vector<2x32xf32>
    %151 = arith.mulf %146, %148 : vector<2x32xf32>
    %152 = arith.addf %150, %151 : vector<2x32xf32>
    %153 = math.tanh %152 : vector<2x32xf32>
    %154 = arith.mulf %149, %153 : vector<2x32xf32>
    %155 = arith.truncf %154 : vector<2x32xf32> to vector<2x32xbf16>
    %cst_24 = arith.constant dense<0.000000e+00> : vector<2x128xf32>
    %156 = tpu.matmul %155, %2, %cst_24 {dimension_numbers = #tpu.dot_dimension_numbers<[1], [0], [0], [1], [0, 0, 1, 1], [], []>} : vector<2x32xbf16>, vector<32x128xbf16>, vector<2x128xf32> -> vector<2x128xf32>
    %157 = vector.extract_strided_slice %135 {offsets = [0, 128], sizes = [2, 128], strides = [1, 1]} : vector<2x256xf32> to vector<2x128xf32>
    %158 = arith.addf %156, %157 : vector<2x128xf32>
    %159 = vector.broadcast %3 : vector<1x128xf32> to vector<2x128xf32>
    %160 = arith.addf %158, %159 : vector<2x128xf32>
    %161 = vector.extract_strided_slice %131 {offsets = [0, 32], sizes = [2, 32], strides = [1, 1]} : vector<2x64xf32> to vector<2x32xf32>
    %162 = math.tanh %160 : vector<2x128xf32>
    %163 = vector.broadcast %12 : vector<1x128xf32> to vector<2x128xf32>
    %164 = arith.mulf %163, %162 : vector<2x128xf32>
    %165 = vector.broadcast %15 : vector<1x128xf32> to vector<2x128xf32>
    %166 = arith.addf %164, %165 : vector<2x128xf32>
    %167 = vector.extract_strided_slice %166 {offsets = [0, 0], sizes = [2, 32], strides = [1, 1]} : vector<2x128xf32> to vector<2x32xf32>
    %168 = vector.extract_strided_slice %166 {offsets = [0, 32], sizes = [2, 32], strides = [1, 1]} : vector<2x128xf32> to vector<2x32xf32>
    %169 = vector.extract_strided_slice %166 {offsets = [0, 64], sizes = [2, 32], strides = [1, 1]} : vector<2x128xf32> to vector<2x32xf32>
    %170 = vector.extract_strided_slice %166 {offsets = [0, 96], sizes = [2, 32], strides = [1, 1]} : vector<2x128xf32> to vector<2x32xf32>
    %171 = arith.mulf %168, %161 : vector<2x32xf32>
    %172 = arith.mulf %167, %169 : vector<2x32xf32>
    %173 = arith.addf %171, %172 : vector<2x32xf32>
    %174 = math.tanh %173 : vector<2x32xf32>
    %175 = arith.mulf %170, %174 : vector<2x32xf32>
    %176 = tpu.concatenate %154, %175 in 1 : vector<2x32xf32>, vector<2x32xf32> -> vector<2x64xf32>
    %177 = tpu.concatenate %152, %173 in 1 : vector<2x32xf32>, vector<2x32xf32> -> vector<2x64xf32>
    %178 = vector.shape_cast %133 : vector<2x1xi1> to vector<2x1xi1>
    %179 = vector.broadcast %178 : vector<2x1xi1> to vector<2x64xi1>
    %180 = arith.select %179, %176, %128 : vector<2x64xi1>, vector<2x64xf32>
    %181 = vector.shape_cast %133 : vector<2x1xi1> to vector<2x1xi1>
    %182 = vector.broadcast %181 : vector<2x1xi1> to vector<2x64xi1>
    %183 = arith.select %182, %177, %131 : vector<2x64xi1>, vector<2x64xf32>
    %c3_i32 = arith.constant 3 : i32
    %184 = vector.broadcast %c3_i32 : i32 to vector<2x1xi32>
    %185 = arith.cmpi sgt, %0, %184 : vector<2x1xi32>
    %186 = arith.truncf %180 : vector<2x64xf32> to vector<2x64xbf16>
    %cst_25 = arith.constant dense<0.000000e+00> : vector<2x256xf32>
    %187 = tpu.matmul %186, %1, %cst_25 {dimension_numbers = #tpu.dot_dimension_numbers<[1], [0], [0], [1], [0, 0, 1, 1], [], []>} : vector<2x64xbf16>, vector<64x256xbf16>, vector<2x256xf32> -> vector<2x256xf32>
    %188 = vector.extract_strided_slice %25 {offsets = [0, 3, 0], sizes = [2, 1, 128], strides = [1, 1, 1]} : vector<2x8x128xf32> to vector<2x1x128xf32>
    %189 = vector.shape_cast %188 : vector<2x1x128xf32> to vector<2x128xf32>
    %190 = vector.extract_strided_slice %187 {offsets = [0, 0], sizes = [2, 128], strides = [1, 1]} : vector<2x256xf32> to vector<2x128xf32>
    %191 = arith.addf %189, %190 : vector<2x128xf32>
    %192 = vector.extract_strided_slice %183 {offsets = [0, 0], sizes = [2, 32], strides = [1, 1]} : vector<2x64xf32> to vector<2x32xf32>
    %193 = math.tanh %191 : vector<2x128xf32>
    %194 = vector.broadcast %12 : vector<1x128xf32> to vector<2x128xf32>
    %195 = arith.mulf %194, %193 : vector<2x128xf32>
    %196 = vector.broadcast %15 : vector<1x128xf32> to vector<2x128xf32>
    %197 = arith.addf %195, %196 : vector<2x128xf32>
    %198 = vector.extract_strided_slice %197 {offsets = [0, 0], sizes = [2, 32], strides = [1, 1]} : vector<2x128xf32> to vector<2x32xf32>
    %199 = vector.extract_strided_slice %197 {offsets = [0, 32], sizes = [2, 32], strides = [1, 1]} : vector<2x128xf32> to vector<2x32xf32>
    %200 = vector.extract_strided_slice %197 {offsets = [0, 64], sizes = [2, 32], strides = [1, 1]} : vector<2x128xf32> to vector<2x32xf32>
    %201 = vector.extract_strided_slice %197 {offsets = [0, 96], sizes = [2, 32], strides = [1, 1]} : vector<2x128xf32> to vector<2x32xf32>
    %202 = arith.mulf %199, %192 : vector<2x32xf32>
    %203 = arith.mulf %198, %200 : vector<2x32xf32>
    %204 = arith.addf %202, %203 : vector<2x32xf32>
    %205 = math.tanh %204 : vector<2x32xf32>
    %206 = arith.mulf %201, %205 : vector<2x32xf32>
    %207 = arith.truncf %206 : vector<2x32xf32> to vector<2x32xbf16>
    %cst_26 = arith.constant dense<0.000000e+00> : vector<2x128xf32>
    %208 = tpu.matmul %207, %2, %cst_26 {dimension_numbers = #tpu.dot_dimension_numbers<[1], [0], [0], [1], [0, 0, 1, 1], [], []>} : vector<2x32xbf16>, vector<32x128xbf16>, vector<2x128xf32> -> vector<2x128xf32>
    %209 = vector.extract_strided_slice %187 {offsets = [0, 128], sizes = [2, 128], strides = [1, 1]} : vector<2x256xf32> to vector<2x128xf32>
    %210 = arith.addf %208, %209 : vector<2x128xf32>
    %211 = vector.broadcast %3 : vector<1x128xf32> to vector<2x128xf32>
    %212 = arith.addf %210, %211 : vector<2x128xf32>
    %213 = vector.extract_strided_slice %183 {offsets = [0, 32], sizes = [2, 32], strides = [1, 1]} : vector<2x64xf32> to vector<2x32xf32>
    %214 = math.tanh %212 : vector<2x128xf32>
    %215 = vector.broadcast %12 : vector<1x128xf32> to vector<2x128xf32>
    %216 = arith.mulf %215, %214 : vector<2x128xf32>
    %217 = vector.broadcast %15 : vector<1x128xf32> to vector<2x128xf32>
    %218 = arith.addf %216, %217 : vector<2x128xf32>
    %219 = vector.extract_strided_slice %218 {offsets = [0, 0], sizes = [2, 32], strides = [1, 1]} : vector<2x128xf32> to vector<2x32xf32>
    %220 = vector.extract_strided_slice %218 {offsets = [0, 32], sizes = [2, 32], strides = [1, 1]} : vector<2x128xf32> to vector<2x32xf32>
    %221 = vector.extract_strided_slice %218 {offsets = [0, 64], sizes = [2, 32], strides = [1, 1]} : vector<2x128xf32> to vector<2x32xf32>
    %222 = vector.extract_strided_slice %218 {offsets = [0, 96], sizes = [2, 32], strides = [1, 1]} : vector<2x128xf32> to vector<2x32xf32>
    %223 = arith.mulf %220, %213 : vector<2x32xf32>
    %224 = arith.mulf %219, %221 : vector<2x32xf32>
    %225 = arith.addf %223, %224 : vector<2x32xf32>
    %226 = math.tanh %225 : vector<2x32xf32>
    %227 = arith.mulf %222, %226 : vector<2x32xf32>
    %228 = tpu.concatenate %206, %227 in 1 : vector<2x32xf32>, vector<2x32xf32> -> vector<2x64xf32>
    %229 = tpu.concatenate %204, %225 in 1 : vector<2x32xf32>, vector<2x32xf32> -> vector<2x64xf32>
    %230 = vector.shape_cast %185 : vector<2x1xi1> to vector<2x1xi1>
    %231 = vector.broadcast %230 : vector<2x1xi1> to vector<2x64xi1>
    %232 = arith.select %231, %228, %180 : vector<2x64xi1>, vector<2x64xf32>
    %233 = vector.shape_cast %185 : vector<2x1xi1> to vector<2x1xi1>
    %234 = vector.broadcast %233 : vector<2x1xi1> to vector<2x64xi1>
    %235 = arith.select %234, %229, %183 : vector<2x64xi1>, vector<2x64xf32>
    %c4_i32 = arith.constant 4 : i32
    %236 = vector.broadcast %c4_i32 : i32 to vector<2x1xi32>
    %237 = arith.cmpi sgt, %0, %236 : vector<2x1xi32>
    %238 = arith.truncf %232 : vector<2x64xf32> to vector<2x64xbf16>
    %cst_27 = arith.constant dense<0.000000e+00> : vector<2x256xf32>
    %239 = tpu.matmul %238, %1, %cst_27 {dimension_numbers = #tpu.dot_dimension_numbers<[1], [0], [0], [1], [0, 0, 1, 1], [], []>} : vector<2x64xbf16>, vector<64x256xbf16>, vector<2x256xf32> -> vector<2x256xf32>
    %240 = vector.extract_strided_slice %25 {offsets = [0, 4, 0], sizes = [2, 1, 128], strides = [1, 1, 1]} : vector<2x8x128xf32> to vector<2x1x128xf32>
    %241 = vector.shape_cast %240 : vector<2x1x128xf32> to vector<2x128xf32>
    %242 = vector.extract_strided_slice %239 {offsets = [0, 0], sizes = [2, 128], strides = [1, 1]} : vector<2x256xf32> to vector<2x128xf32>
    %243 = arith.addf %241, %242 : vector<2x128xf32>
    %244 = vector.extract_strided_slice %235 {offsets = [0, 0], sizes = [2, 32], strides = [1, 1]} : vector<2x64xf32> to vector<2x32xf32>
    %245 = math.tanh %243 : vector<2x128xf32>
    %246 = vector.broadcast %12 : vector<1x128xf32> to vector<2x128xf32>
    %247 = arith.mulf %246, %245 : vector<2x128xf32>
    %248 = vector.broadcast %15 : vector<1x128xf32> to vector<2x128xf32>
    %249 = arith.addf %247, %248 : vector<2x128xf32>
    %250 = vector.extract_strided_slice %249 {offsets = [0, 0], sizes = [2, 32], strides = [1, 1]} : vector<2x128xf32> to vector<2x32xf32>
    %251 = vector.extract_strided_slice %249 {offsets = [0, 32], sizes = [2, 32], strides = [1, 1]} : vector<2x128xf32> to vector<2x32xf32>
    %252 = vector.extract_strided_slice %249 {offsets = [0, 64], sizes = [2, 32], strides = [1, 1]} : vector<2x128xf32> to vector<2x32xf32>
    %253 = vector.extract_strided_slice %249 {offsets = [0, 96], sizes = [2, 32], strides = [1, 1]} : vector<2x128xf32> to vector<2x32xf32>
    %254 = arith.mulf %251, %244 : vector<2x32xf32>
    %255 = arith.mulf %250, %252 : vector<2x32xf32>
    %256 = arith.addf %254, %255 : vector<2x32xf32>
    %257 = math.tanh %256 : vector<2x32xf32>
    %258 = arith.mulf %253, %257 : vector<2x32xf32>
    %259 = arith.truncf %258 : vector<2x32xf32> to vector<2x32xbf16>
    %cst_28 = arith.constant dense<0.000000e+00> : vector<2x128xf32>
    %260 = tpu.matmul %259, %2, %cst_28 {dimension_numbers = #tpu.dot_dimension_numbers<[1], [0], [0], [1], [0, 0, 1, 1], [], []>} : vector<2x32xbf16>, vector<32x128xbf16>, vector<2x128xf32> -> vector<2x128xf32>
    %261 = vector.extract_strided_slice %239 {offsets = [0, 128], sizes = [2, 128], strides = [1, 1]} : vector<2x256xf32> to vector<2x128xf32>
    %262 = arith.addf %260, %261 : vector<2x128xf32>
    %263 = vector.broadcast %3 : vector<1x128xf32> to vector<2x128xf32>
    %264 = arith.addf %262, %263 : vector<2x128xf32>
    %265 = vector.extract_strided_slice %235 {offsets = [0, 32], sizes = [2, 32], strides = [1, 1]} : vector<2x64xf32> to vector<2x32xf32>
    %266 = math.tanh %264 : vector<2x128xf32>
    %267 = vector.broadcast %12 : vector<1x128xf32> to vector<2x128xf32>
    %268 = arith.mulf %267, %266 : vector<2x128xf32>
    %269 = vector.broadcast %15 : vector<1x128xf32> to vector<2x128xf32>
    %270 = arith.addf %268, %269 : vector<2x128xf32>
    %271 = vector.extract_strided_slice %270 {offsets = [0, 0], sizes = [2, 32], strides = [1, 1]} : vector<2x128xf32> to vector<2x32xf32>
    %272 = vector.extract_strided_slice %270 {offsets = [0, 32], sizes = [2, 32], strides = [1, 1]} : vector<2x128xf32> to vector<2x32xf32>
    %273 = vector.extract_strided_slice %270 {offsets = [0, 64], sizes = [2, 32], strides = [1, 1]} : vector<2x128xf32> to vector<2x32xf32>
    %274 = vector.extract_strided_slice %270 {offsets = [0, 96], sizes = [2, 32], strides = [1, 1]} : vector<2x128xf32> to vector<2x32xf32>
    %275 = arith.mulf %272, %265 : vector<2x32xf32>
    %276 = arith.mulf %271, %273 : vector<2x32xf32>
    %277 = arith.addf %275, %276 : vector<2x32xf32>
    %278 = math.tanh %277 : vector<2x32xf32>
    %279 = arith.mulf %274, %278 : vector<2x32xf32>
    %280 = tpu.concatenate %258, %279 in 1 : vector<2x32xf32>, vector<2x32xf32> -> vector<2x64xf32>
    %281 = tpu.concatenate %256, %277 in 1 : vector<2x32xf32>, vector<2x32xf32> -> vector<2x64xf32>
    %282 = vector.shape_cast %237 : vector<2x1xi1> to vector<2x1xi1>
    %283 = vector.broadcast %282 : vector<2x1xi1> to vector<2x64xi1>
    %284 = arith.select %283, %280, %232 : vector<2x64xi1>, vector<2x64xf32>
    %285 = vector.shape_cast %237 : vector<2x1xi1> to vector<2x1xi1>
    %286 = vector.broadcast %285 : vector<2x1xi1> to vector<2x64xi1>
    %287 = arith.select %286, %281, %235 : vector<2x64xi1>, vector<2x64xf32>
    %c5_i32 = arith.constant 5 : i32
    %288 = vector.broadcast %c5_i32 : i32 to vector<2x1xi32>
    %289 = arith.cmpi sgt, %0, %288 : vector<2x1xi32>
    %290 = arith.truncf %284 : vector<2x64xf32> to vector<2x64xbf16>
    %cst_29 = arith.constant dense<0.000000e+00> : vector<2x256xf32>
    %291 = tpu.matmul %290, %1, %cst_29 {dimension_numbers = #tpu.dot_dimension_numbers<[1], [0], [0], [1], [0, 0, 1, 1], [], []>} : vector<2x64xbf16>, vector<64x256xbf16>, vector<2x256xf32> -> vector<2x256xf32>
    %292 = vector.extract_strided_slice %25 {offsets = [0, 5, 0], sizes = [2, 1, 128], strides = [1, 1, 1]} : vector<2x8x128xf32> to vector<2x1x128xf32>
    %293 = vector.shape_cast %292 : vector<2x1x128xf32> to vector<2x128xf32>
    %294 = vector.extract_strided_slice %291 {offsets = [0, 0], sizes = [2, 128], strides = [1, 1]} : vector<2x256xf32> to vector<2x128xf32>
    %295 = arith.addf %293, %294 : vector<2x128xf32>
    %296 = vector.extract_strided_slice %287 {offsets = [0, 0], sizes = [2, 32], strides = [1, 1]} : vector<2x64xf32> to vector<2x32xf32>
    %297 = math.tanh %295 : vector<2x128xf32>
    %298 = vector.broadcast %12 : vector<1x128xf32> to vector<2x128xf32>
    %299 = arith.mulf %298, %297 : vector<2x128xf32>
    %300 = vector.broadcast %15 : vector<1x128xf32> to vector<2x128xf32>
    %301 = arith.addf %299, %300 : vector<2x128xf32>
    %302 = vector.extract_strided_slice %301 {offsets = [0, 0], sizes = [2, 32], strides = [1, 1]} : vector<2x128xf32> to vector<2x32xf32>
    %303 = vector.extract_strided_slice %301 {offsets = [0, 32], sizes = [2, 32], strides = [1, 1]} : vector<2x128xf32> to vector<2x32xf32>
    %304 = vector.extract_strided_slice %301 {offsets = [0, 64], sizes = [2, 32], strides = [1, 1]} : vector<2x128xf32> to vector<2x32xf32>
    %305 = vector.extract_strided_slice %301 {offsets = [0, 96], sizes = [2, 32], strides = [1, 1]} : vector<2x128xf32> to vector<2x32xf32>
    %306 = arith.mulf %303, %296 : vector<2x32xf32>
    %307 = arith.mulf %302, %304 : vector<2x32xf32>
    %308 = arith.addf %306, %307 : vector<2x32xf32>
    %309 = math.tanh %308 : vector<2x32xf32>
    %310 = arith.mulf %305, %309 : vector<2x32xf32>
    %311 = arith.truncf %310 : vector<2x32xf32> to vector<2x32xbf16>
    %cst_30 = arith.constant dense<0.000000e+00> : vector<2x128xf32>
    %312 = tpu.matmul %311, %2, %cst_30 {dimension_numbers = #tpu.dot_dimension_numbers<[1], [0], [0], [1], [0, 0, 1, 1], [], []>} : vector<2x32xbf16>, vector<32x128xbf16>, vector<2x128xf32> -> vector<2x128xf32>
    %313 = vector.extract_strided_slice %291 {offsets = [0, 128], sizes = [2, 128], strides = [1, 1]} : vector<2x256xf32> to vector<2x128xf32>
    %314 = arith.addf %312, %313 : vector<2x128xf32>
    %315 = vector.broadcast %3 : vector<1x128xf32> to vector<2x128xf32>
    %316 = arith.addf %314, %315 : vector<2x128xf32>
    %317 = vector.extract_strided_slice %287 {offsets = [0, 32], sizes = [2, 32], strides = [1, 1]} : vector<2x64xf32> to vector<2x32xf32>
    %318 = math.tanh %316 : vector<2x128xf32>
    %319 = vector.broadcast %12 : vector<1x128xf32> to vector<2x128xf32>
    %320 = arith.mulf %319, %318 : vector<2x128xf32>
    %321 = vector.broadcast %15 : vector<1x128xf32> to vector<2x128xf32>
    %322 = arith.addf %320, %321 : vector<2x128xf32>
    %323 = vector.extract_strided_slice %322 {offsets = [0, 0], sizes = [2, 32], strides = [1, 1]} : vector<2x128xf32> to vector<2x32xf32>
    %324 = vector.extract_strided_slice %322 {offsets = [0, 32], sizes = [2, 32], strides = [1, 1]} : vector<2x128xf32> to vector<2x32xf32>
    %325 = vector.extract_strided_slice %322 {offsets = [0, 64], sizes = [2, 32], strides = [1, 1]} : vector<2x128xf32> to vector<2x32xf32>
    %326 = vector.extract_strided_slice %322 {offsets = [0, 96], sizes = [2, 32], strides = [1, 1]} : vector<2x128xf32> to vector<2x32xf32>
    %327 = arith.mulf %324, %317 : vector<2x32xf32>
    %328 = arith.mulf %323, %325 : vector<2x32xf32>
    %329 = arith.addf %327, %328 : vector<2x32xf32>
    %330 = math.tanh %329 : vector<2x32xf32>
    %331 = arith.mulf %326, %330 : vector<2x32xf32>
    %332 = tpu.concatenate %310, %331 in 1 : vector<2x32xf32>, vector<2x32xf32> -> vector<2x64xf32>
    %333 = tpu.concatenate %308, %329 in 1 : vector<2x32xf32>, vector<2x32xf32> -> vector<2x64xf32>
    %334 = vector.shape_cast %289 : vector<2x1xi1> to vector<2x1xi1>
    %335 = vector.broadcast %334 : vector<2x1xi1> to vector<2x64xi1>
    %336 = arith.select %335, %332, %284 : vector<2x64xi1>, vector<2x64xf32>
    %337 = vector.shape_cast %289 : vector<2x1xi1> to vector<2x1xi1>
    %338 = vector.broadcast %337 : vector<2x1xi1> to vector<2x64xi1>
    %339 = arith.select %338, %333, %287 : vector<2x64xi1>, vector<2x64xf32>
    %c6_i32 = arith.constant 6 : i32
    %340 = vector.broadcast %c6_i32 : i32 to vector<2x1xi32>
    %341 = arith.cmpi sgt, %0, %340 : vector<2x1xi32>
    %342 = arith.truncf %336 : vector<2x64xf32> to vector<2x64xbf16>
    %cst_31 = arith.constant dense<0.000000e+00> : vector<2x256xf32>
    %343 = tpu.matmul %342, %1, %cst_31 {dimension_numbers = #tpu.dot_dimension_numbers<[1], [0], [0], [1], [0, 0, 1, 1], [], []>} : vector<2x64xbf16>, vector<64x256xbf16>, vector<2x256xf32> -> vector<2x256xf32>
    %344 = vector.extract_strided_slice %25 {offsets = [0, 6, 0], sizes = [2, 1, 128], strides = [1, 1, 1]} : vector<2x8x128xf32> to vector<2x1x128xf32>
    %345 = vector.shape_cast %344 : vector<2x1x128xf32> to vector<2x128xf32>
    %346 = vector.extract_strided_slice %343 {offsets = [0, 0], sizes = [2, 128], strides = [1, 1]} : vector<2x256xf32> to vector<2x128xf32>
    %347 = arith.addf %345, %346 : vector<2x128xf32>
    %348 = vector.extract_strided_slice %339 {offsets = [0, 0], sizes = [2, 32], strides = [1, 1]} : vector<2x64xf32> to vector<2x32xf32>
    %349 = math.tanh %347 : vector<2x128xf32>
    %350 = vector.broadcast %12 : vector<1x128xf32> to vector<2x128xf32>
    %351 = arith.mulf %350, %349 : vector<2x128xf32>
    %352 = vector.broadcast %15 : vector<1x128xf32> to vector<2x128xf32>
    %353 = arith.addf %351, %352 : vector<2x128xf32>
    %354 = vector.extract_strided_slice %353 {offsets = [0, 0], sizes = [2, 32], strides = [1, 1]} : vector<2x128xf32> to vector<2x32xf32>
    %355 = vector.extract_strided_slice %353 {offsets = [0, 32], sizes = [2, 32], strides = [1, 1]} : vector<2x128xf32> to vector<2x32xf32>
    %356 = vector.extract_strided_slice %353 {offsets = [0, 64], sizes = [2, 32], strides = [1, 1]} : vector<2x128xf32> to vector<2x32xf32>
    %357 = vector.extract_strided_slice %353 {offsets = [0, 96], sizes = [2, 32], strides = [1, 1]} : vector<2x128xf32> to vector<2x32xf32>
    %358 = arith.mulf %355, %348 : vector<2x32xf32>
    %359 = arith.mulf %354, %356 : vector<2x32xf32>
    %360 = arith.addf %358, %359 : vector<2x32xf32>
    %361 = math.tanh %360 : vector<2x32xf32>
    %362 = arith.mulf %357, %361 : vector<2x32xf32>
    %363 = arith.truncf %362 : vector<2x32xf32> to vector<2x32xbf16>
    %cst_32 = arith.constant dense<0.000000e+00> : vector<2x128xf32>
    %364 = tpu.matmul %363, %2, %cst_32 {dimension_numbers = #tpu.dot_dimension_numbers<[1], [0], [0], [1], [0, 0, 1, 1], [], []>} : vector<2x32xbf16>, vector<32x128xbf16>, vector<2x128xf32> -> vector<2x128xf32>
    %365 = vector.extract_strided_slice %343 {offsets = [0, 128], sizes = [2, 128], strides = [1, 1]} : vector<2x256xf32> to vector<2x128xf32>
    %366 = arith.addf %364, %365 : vector<2x128xf32>
    %367 = vector.broadcast %3 : vector<1x128xf32> to vector<2x128xf32>
    %368 = arith.addf %366, %367 : vector<2x128xf32>
    %369 = vector.extract_strided_slice %339 {offsets = [0, 32], sizes = [2, 32], strides = [1, 1]} : vector<2x64xf32> to vector<2x32xf32>
    %370 = math.tanh %368 : vector<2x128xf32>
    %371 = vector.broadcast %12 : vector<1x128xf32> to vector<2x128xf32>
    %372 = arith.mulf %371, %370 : vector<2x128xf32>
    %373 = vector.broadcast %15 : vector<1x128xf32> to vector<2x128xf32>
    %374 = arith.addf %372, %373 : vector<2x128xf32>
    %375 = vector.extract_strided_slice %374 {offsets = [0, 0], sizes = [2, 32], strides = [1, 1]} : vector<2x128xf32> to vector<2x32xf32>
    %376 = vector.extract_strided_slice %374 {offsets = [0, 32], sizes = [2, 32], strides = [1, 1]} : vector<2x128xf32> to vector<2x32xf32>
    %377 = vector.extract_strided_slice %374 {offsets = [0, 64], sizes = [2, 32], strides = [1, 1]} : vector<2x128xf32> to vector<2x32xf32>
    %378 = vector.extract_strided_slice %374 {offsets = [0, 96], sizes = [2, 32], strides = [1, 1]} : vector<2x128xf32> to vector<2x32xf32>
    %379 = arith.mulf %376, %369 : vector<2x32xf32>
    %380 = arith.mulf %375, %377 : vector<2x32xf32>
    %381 = arith.addf %379, %380 : vector<2x32xf32>
    %382 = math.tanh %381 : vector<2x32xf32>
    %383 = arith.mulf %378, %382 : vector<2x32xf32>
    %384 = tpu.concatenate %362, %383 in 1 : vector<2x32xf32>, vector<2x32xf32> -> vector<2x64xf32>
    %385 = tpu.concatenate %360, %381 in 1 : vector<2x32xf32>, vector<2x32xf32> -> vector<2x64xf32>
    %386 = vector.shape_cast %341 : vector<2x1xi1> to vector<2x1xi1>
    %387 = vector.broadcast %386 : vector<2x1xi1> to vector<2x64xi1>
    %388 = arith.select %387, %384, %336 : vector<2x64xi1>, vector<2x64xf32>
    %389 = vector.shape_cast %341 : vector<2x1xi1> to vector<2x1xi1>
    %390 = vector.broadcast %389 : vector<2x1xi1> to vector<2x64xi1>
    %391 = arith.select %390, %385, %339 : vector<2x64xi1>, vector<2x64xf32>
    %c7_i32 = arith.constant 7 : i32
    %392 = vector.broadcast %c7_i32 : i32 to vector<2x1xi32>
    %393 = arith.cmpi sgt, %0, %392 : vector<2x1xi32>
    %394 = arith.truncf %388 : vector<2x64xf32> to vector<2x64xbf16>
    %cst_33 = arith.constant dense<0.000000e+00> : vector<2x256xf32>
    %395 = tpu.matmul %394, %1, %cst_33 {dimension_numbers = #tpu.dot_dimension_numbers<[1], [0], [0], [1], [0, 0, 1, 1], [], []>} : vector<2x64xbf16>, vector<64x256xbf16>, vector<2x256xf32> -> vector<2x256xf32>
    %396 = vector.extract_strided_slice %25 {offsets = [0, 7, 0], sizes = [2, 1, 128], strides = [1, 1, 1]} : vector<2x8x128xf32> to vector<2x1x128xf32>
    %397 = vector.shape_cast %396 : vector<2x1x128xf32> to vector<2x128xf32>
    %398 = vector.extract_strided_slice %395 {offsets = [0, 0], sizes = [2, 128], strides = [1, 1]} : vector<2x256xf32> to vector<2x128xf32>
    %399 = arith.addf %397, %398 : vector<2x128xf32>
    %400 = vector.extract_strided_slice %391 {offsets = [0, 0], sizes = [2, 32], strides = [1, 1]} : vector<2x64xf32> to vector<2x32xf32>
    %401 = math.tanh %399 : vector<2x128xf32>
    %402 = vector.broadcast %12 : vector<1x128xf32> to vector<2x128xf32>
    %403 = arith.mulf %402, %401 : vector<2x128xf32>
    %404 = vector.broadcast %15 : vector<1x128xf32> to vector<2x128xf32>
    %405 = arith.addf %403, %404 : vector<2x128xf32>
    %406 = vector.extract_strided_slice %405 {offsets = [0, 0], sizes = [2, 32], strides = [1, 1]} : vector<2x128xf32> to vector<2x32xf32>
    %407 = vector.extract_strided_slice %405 {offsets = [0, 32], sizes = [2, 32], strides = [1, 1]} : vector<2x128xf32> to vector<2x32xf32>
    %408 = vector.extract_strided_slice %405 {offsets = [0, 64], sizes = [2, 32], strides = [1, 1]} : vector<2x128xf32> to vector<2x32xf32>
    %409 = vector.extract_strided_slice %405 {offsets = [0, 96], sizes = [2, 32], strides = [1, 1]} : vector<2x128xf32> to vector<2x32xf32>
    %410 = arith.mulf %407, %400 : vector<2x32xf32>
    %411 = arith.mulf %406, %408 : vector<2x32xf32>
    %412 = arith.addf %410, %411 : vector<2x32xf32>
    %413 = math.tanh %412 : vector<2x32xf32>
    %414 = arith.mulf %409, %413 : vector<2x32xf32>
    %415 = arith.truncf %414 : vector<2x32xf32> to vector<2x32xbf16>
    %cst_34 = arith.constant dense<0.000000e+00> : vector<2x128xf32>
    %416 = tpu.matmul %415, %2, %cst_34 {dimension_numbers = #tpu.dot_dimension_numbers<[1], [0], [0], [1], [0, 0, 1, 1], [], []>} : vector<2x32xbf16>, vector<32x128xbf16>, vector<2x128xf32> -> vector<2x128xf32>
    %417 = vector.extract_strided_slice %395 {offsets = [0, 128], sizes = [2, 128], strides = [1, 1]} : vector<2x256xf32> to vector<2x128xf32>
    %418 = arith.addf %416, %417 : vector<2x128xf32>
    %419 = vector.broadcast %3 : vector<1x128xf32> to vector<2x128xf32>
    %420 = arith.addf %418, %419 : vector<2x128xf32>
    %421 = vector.extract_strided_slice %391 {offsets = [0, 32], sizes = [2, 32], strides = [1, 1]} : vector<2x64xf32> to vector<2x32xf32>
    %422 = math.tanh %420 : vector<2x128xf32>
    %423 = vector.broadcast %12 : vector<1x128xf32> to vector<2x128xf32>
    %424 = arith.mulf %423, %422 : vector<2x128xf32>
    %425 = vector.broadcast %15 : vector<1x128xf32> to vector<2x128xf32>
    %426 = arith.addf %424, %425 : vector<2x128xf32>
    %427 = vector.extract_strided_slice %426 {offsets = [0, 0], sizes = [2, 32], strides = [1, 1]} : vector<2x128xf32> to vector<2x32xf32>
    %428 = vector.extract_strided_slice %426 {offsets = [0, 32], sizes = [2, 32], strides = [1, 1]} : vector<2x128xf32> to vector<2x32xf32>
    %429 = vector.extract_strided_slice %426 {offsets = [0, 64], sizes = [2, 32], strides = [1, 1]} : vector<2x128xf32> to vector<2x32xf32>
    %430 = vector.extract_strided_slice %426 {offsets = [0, 96], sizes = [2, 32], strides = [1, 1]} : vector<2x128xf32> to vector<2x32xf32>
    %431 = arith.mulf %428, %421 : vector<2x32xf32>
    %432 = arith.mulf %427, %429 : vector<2x32xf32>
    %433 = arith.addf %431, %432 : vector<2x32xf32>
    %434 = math.tanh %433 : vector<2x32xf32>
    %435 = arith.mulf %430, %434 : vector<2x32xf32>
    %436 = tpu.concatenate %414, %435 in 1 : vector<2x32xf32>, vector<2x32xf32> -> vector<2x64xf32>
    %437 = vector.shape_cast %393 : vector<2x1xi1> to vector<2x1xi1>
    %438 = vector.broadcast %437 : vector<2x1xi1> to vector<2x64xi1>
    %439 = arith.select %438, %436, %388 : vector<2x64xi1>, vector<2x64xf32>
    %440 = vector.extract_strided_slice %439 {offsets = [0, 32], sizes = [2, 32], strides = [1, 1]} : vector<2x64xf32> to vector<2x32xf32>
    %441 = arith.truncf %440 : vector<2x32xf32> to vector<2x32xbf16>
    %c0_35 = arith.constant 0 : index
    %c0_36 = arith.constant 0 : index
    %442 = vector.load %arg7[%c0_35, %c0_36] : memref<32x128xbf16, #tpu.memory_space<vmem>>, vector<32x128xbf16>
    %cst_37 = arith.constant dense<0.000000e+00> : vector<2x128xf32>
    %443 = tpu.matmul %441, %442, %cst_37 {dimension_numbers = #tpu.dot_dimension_numbers<[1], [0], [0], [1], [0, 0, 1, 1], [], []>} : vector<2x32xbf16>, vector<32x128xbf16>, vector<2x128xf32> -> vector<2x128xf32>
    %c0_38 = arith.constant 0 : index
    %c0_39 = arith.constant 0 : index
    %444 = vector.load %arg8[%c0_38, %c0_39] : memref<1x128xf32, #tpu.memory_space<vmem>>, vector<1x128xf32>
    %445 = vector.broadcast %444 : vector<1x128xf32> to vector<2x128xf32>
    %446 = arith.addf %443, %445 : vector<2x128xf32>
    %c0_40 = arith.constant 0 : index
    %c0_41 = arith.constant 0 : index
    %447 = vector.load %arg9[%c0_40, %c0_41] : memref<2x128xf32, #tpu.memory_space<vmem>>, vector<2x128xf32>
    tpu.vector_store %arg9[%c0_40, %c0_41], %446 {strides = array<i32>} : memref<2x128xf32, #tpu.memory_space<vmem>>, vector<2x128xf32>,
    return
  }
}

</mosaic_0001>

<bundles_post_ra>
// kernel: lstm_forward.1
= control target key start
LH: loop header
LB: loop body
LE: loop exit
PB: predicated region body
PF: predicated region fallthrough
CT: control target
= control target key end

     0   :  { %14 = vsyncpa [#allocation3], 0  ;;  %s2468_s0 = inlined_call_operand.vmem [shape: f32[2,8,1], index: 0, kind: input, shape index: {}]   ;;  %s2469_s1 = inlined_call_operand.vmem [shape: s32[2,1], index: 1, kind: input, shape index: {}]   ;;  %s2470_s2 = inlined_call_operand.vmem [shape: f32[1,128], index: 2, kind: input, shape index: {}]   ;;  %s2471_s3 = inlined_call_operand.vmem [shape: f32[1,128], index: 3, kind: input, shape index: {}]   ;;  %s2472_s4 = inlined_call_operand.hbm [shape: bf16[64,256], index: 4, kind: input, shape index: {}]   ;;  %s2473_s5 = inlined_call_operand.vmem [shape: bf16[32,128], index: 5, kind: input, shape index: {}]   ;;  %s2474_s6 = inlined_call_operand.vmem [shape: f32[1,128], index: 6, kind: input, shape index: {}]   ;;  %s2475_s7 = inlined_call_operand.hbm [shape: bf16[32,128], index: 7, kind: input, shape index: {}]   ;;  %s2476_s8 = inlined_call_operand.vmem [shape: f32[1,128], index: 8, kind: input, shape index: {}]   ;;  %s2477_s9 = inlined_call_operand.vmem [shape: f32[2,128], index: 9, kind: output, shape index: {}]  }
   0x1   :  { %15 = vsyncpa [#allocation5], 0  ;;  %s1915_s30 = smov [#allocation2]  }
   0x2   :  { %s29_s10 = sshll.u32 %s1915_s30, 4  ;;  %s30_s10 = int_to_ptr.vmem [resolvable:$true] %s29_s10 }
   0x3   :  { %s1879_s11 = scalar_lea.vmem %s30_s10, 1024  ;;  %p1884_p1 = scmp.lt.s32.totalorder %s30_s10, %s30_s10 }
   0x4   :  { %p1880_p0 = scmp.ne.s32.totalorder %s30_s10, %s1879_s11  ;;  %p1885_p2 = scmp.lt.s32.totalorder %s1879_s11, %s1879_s11 }
   0x6   :  { %p1886_p3 = por %p1885_p2, %p1884_p1 }
   0x8   :  { %p1887_p4 = pnand %p1886_p3, %p1880_p0 }
   0xa   :  { %1890 = shalt.err (!%p1887_p4)
}
   0xb   :  { %s1916_s12 = smov 128   ;;  %s1917_s13 = smov 8  }
   0xc   :  { %35 = dma.hbm_to_vmem [thread:$0]  %s2472_s4, 1024, %s30_s10, [#allocation3], %s1916_s12, %s1916_s12, %s1917_s13  }
   0xd   :  { %s1918_s16 = smov [#allocation4]  }
   0xe   :  { %s45_s17 = sshll.u32 %s1918_s16, 4  ;;  %s46_s17 = int_to_ptr.vmem [resolvable:$true] %s45_s17 }
   0xf   :  { %s1899_s18 = scalar_lea.vmem %s46_s17, 256  ;;  %p1904_p6 = scmp.lt.s32.totalorder %s46_s17, %s46_s17 }
  0x10   :  { %p1900_p5 = scmp.ne.s32.totalorder %s46_s17, %s1899_s18  ;;  %p1905_p7 = scmp.lt.s32.totalorder %s1899_s18, %s1899_s18 }
  0x12   :  { %p1906_p8 = por %p1905_p7, %p1904_p6 }
  0x14   :  { %p1907_p9 = pnand %p1906_p8, %p1900_p5 }
  0x16   :  { %1910 = shalt.err (!%p1907_p9)
}
  0x17   :  { %s1919_s19 = smov 64   ;;  %s1920_s20 = smov 4  }
  0x18   :  { %51 = dma.hbm_to_vmem [thread:$0]  %s2475_s7, 256, %s46_s17, [#allocation5], %s1919_s19, %s1919_s19, %s1920_s20  }
  0x19   :  { %1911 = dma.done.wait [#allocation3], 1024  }
  0x1a   :  { %1912 = vsyncadd [#allocation3], 4294966272 }
  0x1b   :  { %1913 = dma.done.wait [#allocation5], 256  }
  0x1c   :  { %1914 = vsyncadd [#allocation5], 4294967040  ;;  %v1921_v0 = vmov 0   ;;  %v1988_v1 = vld [vmem:[#allocation2 + $0x34] ss:$8 sps:$4 sm:$0xff]   ;;  %v83_v7 = vld [vmem:[%s2468_s0 + $0x8] sm:$0xff]  ;;  %v75_v25 = vlaneseq }
  0x1d   :  { %189 = vmatprep.mubr.bf16.mxu0 %v1921_v0  ;;  %1762 = vset.pattern.permute.xlu0 %v1921_v0  ;;  %v1990_v2 = vld [vmem:[#allocation2 + $0x30] ss:$8 sps:$4 sm:$0xff]   ;;  %v1993_v3 = vld [vmem:[#allocation2 + $0x24] ss:$8 sps:$4 sm:$0xff]   ;;  %v1996_v4 = vld [vmem:[#allocation2 + $0x20] ss:$8 sps:$4 sm:$0xff]  }
  0x1e   :  { %1763 = vset.pattern.permute.xlu1 %v1921_v0  ;;  %165 = vmatprep.subr.bf16.mxu0 %v1988_v1  ;;  %v1999_v5 = vld [vmem:[#allocation2 + $0x14] ss:$8 sps:$4 sm:$0xff]   ;;  %v2001_v6 = vld [vmem:[#allocation2 + $0x10] ss:$8 sps:$4 sm:$0xff]   ;;  %v2006_v8 = vld [vmem:[#allocation2 + $0x4] ss:$8 sps:$4 sm:$0xff]  }
  0x1f   :  { %166 = vmatpush1.bf16.msra.mxu0 %v1990_v2  ;;  %92 = vperm.xlu0 %1762, %v83_v7   ;;  %v82_v9 = vld [vmem:[%s2468_s0] sm:$0xff]  ;;  %v76_v27 = vand.u32 127, %v75_v25  ;;  %vm209_vm3 = vcmask 1041409   ;;  %v1922_v30 = vmov 0.5   ;;  %v2045_v42 = vld [vmem:[%s2473_s5 + $0x8] sm:$0xff]   ;;  %v1924_v43 = vmov 0.0  }
  0x20   :  { %167 = vmatprep.subr.bf16.mxu0 %v1993_v3  ;;  %v2014_v10 = vld [vmem:[#allocation2] ss:$8 sps:$4 sm:$0xff]   ;;  %1678 = vmatprep.subr.bf16.mxu1 %v1924_v43  ;;  %vm1925_vm4 = vmmov 0   ;;  %vm247_vm5 = vcmask 261120   ;;  %s1926_s14 = smov 96   ;;  %vm153_vm8 = vcmask 523264  }
  0x21   :  { %v1619_v12 = vld [vmem:[%s2470_s2] ss:$0 sm:$0xff]  ;;  %vm77_vm0 = vcmp.ge.s32.totalorder %v76_v27, 64  ;;  %vm78_vm1 = vcmp.lt.s32.totalorder %v76_v27, 96  ;;  %s1923_s2 = smov 32   ;;  %1682 = vmatprep.mubr.msk.bf16.mxu1 %vm1925_vm4, %v1924_v43  ;;  %1679 = vmatpush3.bf16.msra.mxu1 %v2045_v42 }
  0x22   :  { %v1620_v15 = vld [vmem:[%s2471_s3] ss:$0 sm:$0xff]  ;;  %vm79_vm2 = vmand %vm77_vm0, %vm78_vm1  ;;  %1680 = vmatprep.subr.bf16.mxu1 %v1924_v43 }
  0x23   :  { %168 = vmatpush1.bf16.msra.mxu0 %v1996_v4  ;;  %87 = vperm.xlu0 %1762, %v82_v9   ;;  %v2033_v31 = vsel %vm79_vm2, 1.0, %v1922_v30  ;;  %v2035_v33 = vsel %vm79_vm2, 0.0, %v1922_v30  ;;  %v2054_v44 = vld [vmem:[%s2473_s5] sm:$0xff]  }
  0x24   :  { %169 = vmatprep.subr.bf16.mxu0 %v1999_v5  ;;  %v2081_v50 = vld [vmem:[%s2474_s6] ss:$0 sm:$0xff] }
  0x25   :  { %1681 = vmatpush3.bf16.msra.mxu1 %v2054_v44  ;;  %v2091_v60 = vld [vmem:[%s2469_s1] sm:$0x3] }
  0x26   :  { %352 = vmatprep.subr.bf16.mxu1 %v1988_v1  ;;  %vm112_vm6 = vcmp.gt.s32.totalorder %v2091_v60, 0  ;;  %vm339_vm9 = vcmp.gt.s32.totalorder %v2091_v60, 1  ;;  %vm510_vm11 = vcmp.gt.s32.totalorder %v2091_v60, 2  ;;  %vm683_vm13 = vcmp.gt.s32.totalorder %v2091_v60, 3 }
  0x27   :  { %170 = vmatpush1.bf16.msra.mxu0 %v2001_v6  ;;  %v332_v63 = vsel %vm112_vm6, 1, %v1921_v0  ;;  %vm856_vm15 = vcmp.gt.s32.totalorder %v2091_v60, 4  ;;  %vm1029_vm1 = vcmp.gt.s32.totalorder %v2091_v60, 5 }
  0x28   :  { %171 = vmatprep.subr.bf16.mxu0 %v2006_v8 }
  0x2b   :  { %172 = vmatpush1.bf16.msra.mxu0 %v2014_v10 }
  0x2c   :  { %1686 = vmatprep.subr.bf16.mxu0 %v1924_v43 }
  0x2e   :  { %190 = vmatmul.mubr.bf16.vlgmr.msra.gmra.mxu0 %v1921_v0 }
  0x2f   :  { %1687 = vmatpush3.bf16.msra.mxu0 %v2045_v42  ;;  %1690 = vmatprep.mubr.msk.bf16.mxu0 %vm1925_vm4, %v1924_v43 }
  0x30   :  { %1688 = vmatprep.subr.bf16.mxu0 %v1924_v43 }
  0x33   :  { %1689 = vmatpush3.bf16.msra.mxu0 %v2054_v44 }
  0x34   :  { %523 = vmatprep.subr.bf16.mxu0 %v1988_v1 }
  0x9a   :  { %v93_v11 = vpop.permute.xlu0 %92 }
  0x9b   :  { %v102_v16 = vmul.f32 %v1619_v12, %v93_v11 }
  0x9d   :  { %v2027_v19 = vadd.f32 %v1620_v15, %v102_v16 }
  0x9e   :  { %v88_v13 = vpop.permute.xlu0 %87 }
  0x9f   :  { %v101_v14 = vmul.f32 %v1619_v12, %v88_v13 }
  0xa1   :  { %v2025_v17 = vadd.f32 %v1620_v15, %v101_v14 }
  0xee   :  { %v191_v18 = vpop.f32.mrf.mxu0 }
  0xef   :  { %v199_v20 = vrot.slane %v191_v18, 1  ;;  %v202_v22 = vadd.f32 %v191_v18, %v2025_v17 }
  0xf0   :  { %v2029_v21 = vpop.f32.mrf.mxu0 }
  0xf1   :  { %v203_v23 = vadd.f32 %v199_v20, %v2027_v19 }
  0xf2   :  { %v195_v24 = vpop.f32.mrf.mxu0 }
  0xf3   :  { %1780 = vtanh.f32 %v203_v23 }
  0xf4   :  { %v196_v26 = vpop.f32.mrf.mxu0  ;;  %1782 = vtanh.f32 %v202_v22 }
 0x100   :  { %v1781_v28 = vpop.eup %1780 }
 0x101   :  { %v208_v29 = vrot.slane %v1781_v28, 7  ;;  %v1783_v32 = vpop.eup %1782 }
 0x103   :  { %v210_v34 = vsel %vm209_vm3, %v208_v29, %v1783_v32 }
 0x104   :  { %v212_v35 = vmul.f32 %v210_v34, %v2033_v31 }
 0x106   :  { %v213_v36 = vadd.f32 %v212_v35, %v2035_v33 }
 0x108   :  { %216 = vrot.lane.b32.xlu1 %v213_v36, %s1919_s19  ;;  %v214_v39 = vmul.f32 0.0, %v213_v36 }
 0x17a   :  { %v217_v37 = vpop.permute.xlu1 %216 }
 0x17b   :  { %v219_v38 = vmul.f32 %v217_v37, %v213_v36 }
 0x17d   :  { %221 = vrot.lane.b32.xlu1 %v219_v38, %s1923_s2 }
 0x1ef   :  { %v222_v40 = vpop.permute.xlu1 %221 }
 0x1f0   :  { %v224_v41 = vadd.f32 %v222_v40, %v214_v39 }
 0x1f2   :  { %1784 = vtanh.f32 %v224_v41 }
 0x1ff   :  { %v1785_v45 = vpop.eup %1784 }
 0x200   :  { %227 = vrot.lane.b32.xlu0 %v1785_v45, %s1919_s19 }
 0x272   :  { %v228_v46 = vpop.permute.xlu0 %227 }
 0x273   :  { %v230_v47 = vmul.f32 %v228_v46, %v213_v36 }
 0x275   :  { %v231_v48 = vpack.c.bf16 %v230_v47, %v230_v47 }
 0x277   :  { %233 = vrot.lane.b32.xlu1 %v231_v48, %s1923_s2 }
 0x2e9   :  { %v234_v49 = vpop.permute.xlu1 %233 }
 0x2ea   :  { %1683 = vmatmul.mubr.msk.bf16.vlgmr.msra.gmra.mxu1 %vm247_vm5, %v234_v49 }
 0x2eb   :  { %353 = vmatpush1.bf16.msra.mxu1 %v1990_v2  ;;  %376 = vmatprep.mubr.bf16.mxu1 %v1921_v0 }
 0x2ec   :  { %354 = vmatprep.subr.bf16.mxu1 %v1993_v3 }
 0x2ef   :  { %355 = vmatpush1.bf16.msra.mxu1 %v1996_v4 }
 0x2f0   :  { %356 = vmatprep.subr.bf16.mxu1 %v1999_v5 }
 0x2f3   :  { %357 = vmatpush1.bf16.msra.mxu1 %v2001_v6 }
 0x2f4   :  { %358 = vmatprep.subr.bf16.mxu1 %v2006_v8 }
 0x2f7   :  { %359 = vmatpush1.bf16.msra.mxu1 %v2014_v10 }
 0x2f8   :  { %1694 = vmatprep.subr.bf16.mxu1 %v1924_v43 }
 0x3aa   :  { %v285_v51 = vpop.f32.mrf.mxu1 }
 0x3ab   :  { %v286_v52 = vadd.f32 %v285_v51, %v2029_v21 }
 0x3ac   :  { %v1684_v53 = vpop.f32.mrf.mxu1 }
 0x3ad   :  { %v297_v54 = vadd.f32 %v2081_v50, %v286_v52 }
 0x3ae   :  { %v288_v55 = vpop.f32.mrf.mxu1 }
 0x3af   :  { %1786 = vtanh.f32 %v297_v54 }
 0x3b0   :  { %v1685_v56 = vpop.f32.mrf.mxu1 }
 0x3bc   :  { %v1787_v57 = vpop.eup %1786 }
 0x3bd   :  { %v299_v58 = vmul.f32 %v1787_v57, %v2033_v31 }
 0x3bf   :  { %v300_v59 = vadd.f32 %v299_v58, %v2035_v33 }
 0x3c1   :  { %303 = vrot.lane.b32.xlu0 %v300_v59, %s1919_s19  ;;  %v301_v7 = vmul.f32 0.0, %v300_v59 }
 0x433   :  { %v304_v61 = vpop.permute.xlu0 %303 }
 0x434   :  { %v306_v62 = vmul.f32 %v304_v61, %v300_v59 }
 0x436   :  { %308 = vrot.lane.b32.xlu1 %v306_v62, %s1923_s2 }
 0x43a   :  { %334 = vperm.xlu1 %1763, %v332_v63  }
 0x4a8   :  { %v309_v9 = vpop.permute.xlu1 %308 }
 0x4a9   :  { %v311_v11 = vadd.f32 %v309_v9, %v301_v7 }
 0x4ab   :  { %1788 = vtanh.f32 %v311_v11 }
 0x4b5   :  { %v335_v16 = vpop.permute.xlu1 %334 }
 0x4b6   :  { %vm336_vm7 = vcmp.eq.s32.totalorder %v335_v16, 1 }
 0x4b8   :  { %v1789_v12 = vpop.eup %1788 }
 0x4b9   :  { %314 = vrot.lane.b32.xlu0 %v1789_v12, %s1919_s19 }
 0x4bd   :  { %319 = vrot.lane.b32.xlu0 %v230_v47, %s1923_s2 }
 0x4c1   :  { %328 = vrot.lane.b32.xlu0 %v224_v41, %s1926_s14 }
 0x52b   :  { %v315_v13 = vpop.permute.xlu0 %314 }
 0x52c   :  { %v317_v14 = vmul.f32 %v315_v13, %v300_v59  ;;  %v503_v13 = vsel %vm339_vm9, 1, %v1921_v0 }
 0x52e   :  { %323 = vrot.lane.b32.xlu1 %v317_v14, %s1919_s19 }
 0x52f   :  { %v320_v15 = vpop.permute.xlu0 %319 }
 0x533   :  { %v329_v18 = vpop.permute.xlu0 %328 }
 0x534   :  { %v331_v20 = vsel %vm247_vm5, %v329_v18, %v311_v11 }
 0x535   :  { %v2101_v21 = vsel %vm336_vm7, %v331_v20, 0.0 }
 0x536   :  { %401 = vrot.lane.b32.xlu0 %v2101_v21, %s1923_s2 }
 0x5a0   :  { %v324_v22 = vpop.permute.xlu1 %323 }
 0x5a1   :  { %v326_v23 = vsel %vm247_vm5, %v320_v15, %v324_v22 }
 0x5a2   :  { %v2106_v24 = vsel %vm336_vm7, %v326_v23, 0.0 }
 0x5a3   :  { %v340_v25 = vpack.c.bf16 %v2106_v24, %v2106_v24 }
 0x5a5   :  { %1633 = vmatmul.mubr.msk.bf16.vlgmr.msra.gmra.mxu1 %vm153_vm8, %v340_v25 }
 0x5a6   :  { %1695 = vmatpush3.bf16.msra.mxu1 %v2045_v42  ;;  %1698 = vmatprep.mubr.msk.bf16.mxu1 %vm1925_vm4, %v1924_v43 }
 0x5a7   :  { %1696 = vmatprep.subr.bf16.mxu1 %v1924_v43 }
 0x5a8   :  { %v402_v46 = vpop.permute.xlu0 %401 }
 0x5aa   :  { %1697 = vmatpush3.bf16.msra.mxu1 %v2054_v44 }
 0x5ab   :  { %696 = vmatprep.subr.bf16.mxu1 %v1988_v1 }
 0x665   :  { %v378_v26 = vpop.f32.mrf.mxu1 }
 0x666   :  { %v386_v27 = vrot.slane %v378_v26, 7  ;;  %v390_v30 = vadd.f32 %v378_v26, %v2027_v19 }
 0x667   :  { %v380_v28 = vpop.f32.mrf.mxu1 }
 0x668   :  { %v389_v29 = vadd.f32 %v386_v27, %v2025_v17 }
 0x669   :  { %v382_v32 = vpop.f32.mrf.mxu1 }
 0x66a   :  { %1790 = vtanh.f32 %v389_v29 }
 0x66b   :  { %v383_v34 = vpop.f32.mrf.mxu1  ;;  %1792 = vtanh.f32 %v390_v30 }
 0x677   :  { %v1791_v35 = vpop.eup %1790 }
 0x678   :  { %v395_v36 = vrot.slane %v1791_v35, 1  ;;  %v1793_v37 = vpop.eup %1792 }
 0x67a   :  { %v396_v38 = vsel %vm209_vm3, %v1793_v37, %v395_v36 }
 0x67b   :  { %v398_v39 = vmul.f32 %v396_v38, %v2033_v31 }
 0x67d   :  { %v399_v40 = vadd.f32 %v398_v39, %v2035_v33 }
 0x67f   :  { %406 = vrot.lane.b32.xlu1 %v399_v40, %s1919_s19  ;;  %v404_v47 = vmul.f32 %v402_v46, %v399_v40 }
 0x6f1   :  { %v407_v41 = vpop.permute.xlu1 %406 }
 0x6f2   :  { %v409_v45 = vmul.f32 %v407_v41, %v399_v40 }
 0x6f4   :  { %411 = vrot.lane.b32.xlu1 %v409_v45, %s1923_s2 }
 0x766   :  { %v412_v48 = vpop.permute.xlu1 %411 }
 0x767   :  { %v414_v49 = vadd.f32 %v412_v48, %v404_v47 }
 0x769   :  { %1794 = vtanh.f32 %v414_v49 }
 0x776   :  { %v1795_v51 = vpop.eup %1794 }
 0x777   :  { %417 = vrot.lane.b32.xlu0 %v1795_v51, %s1919_s19 }
 0x7e9   :  { %v418_v52 = vpop.permute.xlu0 %417 }
 0x7ea   :  { %v420_v53 = vmul.f32 %v418_v52, %v399_v40 }
 0x7ec   :  { %v421_v54 = vpack.c.bf16 %v420_v53, %v420_v53 }
 0x7ee   :  { %423 = vrot.lane.b32.xlu1 %v421_v54, %s1923_s2 }
 0x860   :  { %v424_v55 = vpop.permute.xlu1 %423 }
 0x861   :  { %1691 = vmatmul.mubr.msk.bf16.vlgmr.msra.gmra.mxu0 %vm247_vm5, %v424_v55 }
 0x862   :  { %524 = vmatpush1.bf16.msra.mxu0 %v1990_v2  ;;  %547 = vmatprep.mubr.bf16.mxu0 %v1921_v0 }
 0x863   :  { %525 = vmatprep.subr.bf16.mxu0 %v1993_v3 }
 0x866   :  { %526 = vmatpush1.bf16.msra.mxu0 %v1996_v4 }
 0x867   :  { %527 = vmatprep.subr.bf16.mxu0 %v1999_v5 }
 0x86a   :  { %528 = vmatpush1.bf16.msra.mxu0 %v2001_v6 }
 0x86b   :  { %529 = vmatprep.subr.bf16.mxu0 %v2006_v8 }
 0x86e   :  { %530 = vmatpush1.bf16.msra.mxu0 %v2014_v10 }
 0x86f   :  { %1702 = vmatprep.subr.bf16.mxu0 %v1924_v43 }
 0x921   :  { %v462_v56 = vpop.f32.mrf.mxu0 }
 0x922   :  { %v463_v57 = vadd.f32 %v462_v56, %v380_v28 }
 0x923   :  { %v1692_v58 = vpop.f32.mrf.mxu0 }
 0x924   :  { %v468_v59 = vadd.f32 %v2081_v50, %v463_v57 }
 0x925   :  { %v465_v61 = vpop.f32.mrf.mxu0 }
 0x926   :  { %1796 = vtanh.f32 %v468_v59 }
 0x927   :  { %v1693_v62 = vpop.f32.mrf.mxu0 }
 0x933   :  { %v1797_v63 = vpop.eup %1796 }
 0x934   :  { %v470_v7 = vmul.f32 %v1797_v63, %v2033_v31 }
 0x936   :  { %v471_v9 = vadd.f32 %v470_v7, %v2035_v33 }
 0x938   :  { %474 = vrot.lane.b32.xlu0 %v471_v9, %s1919_s19  ;;  %v472_v14 = vmul.f32 %v471_v9, %v2101_v21 }
 0x9aa   :  { %v475_v11 = vpop.permute.xlu0 %474 }
 0x9ab   :  { %v477_v12 = vmul.f32 %v475_v11, %v471_v9 }
 0x9ad   :  { %479 = vrot.lane.b32.xlu1 %v477_v12, %s1923_s2 }
 0x9b1   :  { %505 = vperm.xlu1 %1763, %v503_v13  }
 0xa1f   :  { %v480_v15 = vpop.permute.xlu1 %479 }
 0xa20   :  { %v482_v16 = vadd.f32 %v480_v15, %v472_v14 }
 0xa22   :  { %1798 = vtanh.f32 %v482_v16 }
 0xa2c   :  { %v506_v25 = vpop.permute.xlu1 %505 }
 0xa2d   :  { %vm507_vm10 = vcmp.eq.s32.totalorder %v506_v25, 1 }
 0xa2f   :  { %v1799_v18 = vpop.eup %1798 }
 0xa30   :  { %485 = vrot.lane.b32.xlu0 %v1799_v18, %s1919_s19 }
 0xa34   :  { %490 = vrot.lane.b32.xlu0 %v420_v53, %s1923_s2 }
 0xa38   :  { %499 = vrot.lane.b32.xlu0 %v414_v49, %s1926_s14 }
 0xaa2   :  { %v486_v20 = vpop.permute.xlu0 %485 }
 0xaa3   :  { %v488_v22 = vmul.f32 %v486_v20, %v471_v9 }
 0xaa5   :  { %494 = vrot.lane.b32.xlu1 %v488_v22, %s1919_s19 }
 0xaa6   :  { %v491_v23 = vpop.permute.xlu0 %490 }
 0xaaa   :  { %v500_v26 = vpop.permute.xlu0 %499 }
 0xaab   :  { %v502_v27 = vsel %vm247_vm5, %v500_v26, %v482_v16 }
 0xaac   :  { %v2150_v28 = vsel %vm507_vm10, %v502_v27, %v2101_v21 }
 0xaad   :  { %574 = vrot.lane.b32.xlu0 %v2150_v28, %s1923_s2 }
 0xb17   :  { %v495_v29 = vpop.permute.xlu1 %494 }
 0xb18   :  { %v497_v30 = vsel %vm247_vm5, %v491_v23, %v495_v29  ;;  %v676_v23 = vsel %vm510_vm11, 1, %v1921_v0 }
 0xb19   :  { %v2156_v32 = vsel %vm507_vm10, %v497_v30, %v2106_v24 }
 0xb1a   :  { %v511_v34 = vpack.c.bf16 %v2156_v32, %v2156_v32 }
 0xb1c   :  { %1635 = vmatmul.mubr.msk.bf16.vlgmr.msra.gmra.mxu0 %vm153_vm8, %v511_v34 }
 0xb1d   :  { %1703 = vmatpush3.bf16.msra.mxu0 %v2045_v42  ;;  %1706 = vmatprep.mubr.msk.bf16.mxu0 %vm1925_vm4, %v1924_v43 }
 0xb1e   :  { %1704 = vmatprep.subr.bf16.mxu0 %v1924_v43 }
 0xb1f   :  { %v575_v54 = vpop.permute.xlu0 %574 }
 0xb21   :  { %1705 = vmatpush3.bf16.msra.mxu0 %v2054_v44 }
 0xb22   :  { %869 = vmatprep.subr.bf16.mxu0 %v1988_v1 }
 0xbdc   :  { %v549_v21 = vpop.f32.mrf.mxu0 }
 0xbdd   :  { %v557_v35 = vrot.slane %v549_v21, 6  ;;  %v558_v24 = vrot.slane %v549_v21, 7 }
 0xbde   :  { %v551_v36 = vpop.f32.mrf.mxu0 }
 0xbdf   :  { %v561_v37 = vadd.f32 %v557_v35, %v2025_v17  ;;  %v562_v38 = vadd.f32 %v558_v24, %v2027_v19 }
 0xbe0   :  { %v553_v39 = vpop.f32.mrf.mxu0 }
 0xbe1   :  { %1800 = vtanh.f32 %v561_v37 }
 0xbe2   :  { %1802 = vtanh.f32 %v562_v38  ;;  %v554_v40 = vpop.f32.mrf.mxu0 }
 0xbee   :  { %v1801_v41 = vpop.eup %1800 }
 0xbef   :  { %v1803_v45 = vpop.eup %1802  ;;  %v567_v46 = vrot.slane %v1801_v41, 2 }
 0xbf0   :  { %v568_v47 = vrot.slane %v1803_v45, 1 }
 0xbf2   :  { %v569_v48 = vsel %vm209_vm3, %v568_v47, %v567_v46 }
 0xbf3   :  { %v571_v49 = vmul.f32 %v569_v48, %v2033_v31 }
 0xbf5   :  { %v572_v51 = vadd.f32 %v571_v49, %v2035_v33 }
 0xbf7   :  { %579 = vrot.lane.b32.xlu1 %v572_v51, %s1919_s19  ;;  %v577_v55 = vmul.f32 %v575_v54, %v572_v51 }
 0xc69   :  { %v580_v52 = vpop.permute.xlu1 %579 }
 0xc6a   :  { %v582_v53 = vmul.f32 %v580_v52, %v572_v51 }
 0xc6c   :  { %584 = vrot.lane.b32.xlu1 %v582_v53, %s1923_s2 }
 0xcde   :  { %v585_v56 = vpop.permute.xlu1 %584 }
 0xcdf   :  { %v587_v57 = vadd.f32 %v585_v56, %v577_v55 }
 0xce1   :  { %1804 = vtanh.f32 %v587_v57 }
 0xcee   :  { %v1805_v58 = vpop.eup %1804 }
 0xcef   :  { %590 = vrot.lane.b32.xlu0 %v1805_v58, %s1919_s19 }
 0xd61   :  { %v591_v59 = vpop.permute.xlu0 %590 }
 0xd62   :  { %v593_v61 = vmul.f32 %v591_v59, %v572_v51 }
 0xd64   :  { %v594_v62 = vpack.c.bf16 %v593_v61, %v593_v61 }
 0xd66   :  { %596 = vrot.lane.b32.xlu1 %v594_v62, %s1923_s2 }
 0xdd8   :  { %v597_v63 = vpop.permute.xlu1 %596 }
 0xdd9   :  { %1699 = vmatmul.mubr.msk.bf16.vlgmr.msra.gmra.mxu1 %vm247_vm5, %v597_v63 }
 0xdda   :  { %697 = vmatpush1.bf16.msra.mxu1 %v1990_v2  ;;  %720 = vmatprep.mubr.bf16.mxu1 %v1921_v0 }
 0xddb   :  { %698 = vmatprep.subr.bf16.mxu1 %v1993_v3 }
 0xdde   :  { %699 = vmatpush1.bf16.msra.mxu1 %v1996_v4 }
 0xddf   :  { %700 = vmatprep.subr.bf16.mxu1 %v1999_v5 }
 0xde2   :  { %701 = vmatpush1.bf16.msra.mxu1 %v2001_v6 }
 0xde3   :  { %702 = vmatprep.subr.bf16.mxu1 %v2006_v8 }
 0xde6   :  { %703 = vmatpush1.bf16.msra.mxu1 %v2014_v10 }
 0xde7   :  { %1710 = vmatprep.subr.bf16.mxu1 %v1924_v43 }
 0xe99   :  { %v635_v7 = vpop.f32.mrf.mxu1 }
 0xe9a   :  { %v636_v9 = vadd.f32 %v635_v7, %v551_v36 }
 0xe9b   :  { %v1700_v11 = vpop.f32.mrf.mxu1 }
 0xe9c   :  { %v641_v12 = vadd.f32 %v2081_v50, %v636_v9 }
 0xe9d   :  { %v638_v13 = vpop.f32.mrf.mxu1 }
 0xe9e   :  { %1806 = vtanh.f32 %v641_v12 }
 0xe9f   :  { %v1701_v14 = vpop.f32.mrf.mxu1 }
 0xeab   :  { %v1807_v15 = vpop.eup %1806 }
 0xeac   :  { %v643_v16 = vmul.f32 %v1807_v15, %v2033_v31 }
 0xeae   :  { %v644_v18 = vadd.f32 %v643_v16, %v2035_v33 }
 0xeb0   :  { %647 = vrot.lane.b32.xlu0 %v644_v18, %s1919_s19  ;;  %v645_v25 = vmul.f32 %v644_v18, %v2150_v28 }
 0xf22   :  { %v648_v20 = vpop.permute.xlu0 %647 }
 0xf23   :  { %v650_v22 = vmul.f32 %v648_v20, %v644_v18 }
 0xf25   :  { %652 = vrot.lane.b32.xlu1 %v650_v22, %s1923_s2 }
 0xf29   :  { %678 = vperm.xlu1 %1763, %v676_v23  }
 0xf97   :  { %v653_v26 = vpop.permute.xlu1 %652 }
 0xf98   :  { %v655_v27 = vadd.f32 %v653_v26, %v645_v25 }
 0xf9a   :  { %1808 = vtanh.f32 %v655_v27 }
 0xfa4   :  { %v679_v35 = vpop.permute.xlu1 %678 }
 0xfa5   :  { %vm680_vm12 = vcmp.eq.s32.totalorder %v679_v35, 1 }
 0xfa7   :  { %v1809_v29 = vpop.eup %1808 }
 0xfa8   :  { %658 = vrot.lane.b32.xlu0 %v1809_v29, %s1919_s19 }
 0xfac   :  { %663 = vrot.lane.b32.xlu0 %v593_v61, %s1923_s2 }
 0xfb0   :  { %672 = vrot.lane.b32.xlu0 %v587_v57, %s1926_s14 }
0x101a   :  { %v659_v30 = vpop.permute.xlu0 %658 }
0x101b   :  { %v661_v34 = vmul.f32 %v659_v30, %v644_v18 }
0x101d   :  { %667 = vrot.lane.b32.xlu1 %v661_v34, %s1919_s19 }
0x101e   :  { %v664_v21 = vpop.permute.xlu0 %663 }
0x1022   :  { %v673_v24 = vpop.permute.xlu0 %672 }
0x1023   :  { %v675_v36 = vsel %vm247_vm5, %v673_v24, %v655_v27 }
0x1024   :  { %v2200_v37 = vsel %vm680_vm12, %v675_v36, %v2150_v28 }
0x1025   :  { %747 = vrot.lane.b32.xlu0 %v2200_v37, %s1923_s2 }
0x108f   :  { %v668_v38 = vpop.permute.xlu1 %667 }
0x1090   :  { %v670_v39 = vsel %vm247_vm5, %v664_v21, %v668_v38  ;;  %v849_v21 = vsel %vm683_vm13, 1, %v1921_v0 }
0x1091   :  { %v2206_v40 = vsel %vm680_vm12, %v670_v39, %v2156_v32 }
0x1092   :  { %v684_v41 = vpack.c.bf16 %v2206_v40, %v2206_v40 }
0x1094   :  { %1637 = vmatmul.mubr.msk.bf16.vlgmr.msra.gmra.mxu1 %vm153_vm8, %v684_v41 }
0x1095   :  { %1711 = vmatpush3.bf16.msra.mxu1 %v2045_v42  ;;  %1714 = vmatprep.mubr.msk.bf16.mxu1 %vm1925_vm4, %v1924_v43 }
0x1096   :  { %1712 = vmatprep.subr.bf16.mxu1 %v1924_v43 }
0x1097   :  { %v748_v62 = vpop.permute.xlu0 %747 }
0x1099   :  { %1713 = vmatpush3.bf16.msra.mxu1 %v2054_v44 }
0x109a   :  { %1042 = vmatprep.subr.bf16.mxu1 %v1988_v1 }
0x1154   :  { %v722_v28 = vpop.f32.mrf.mxu1 }
0x1155   :  { %v730_v45 = vrot.slane %v722_v28, 5  ;;  %v731_v32 = vrot.slane %v722_v28, 6 }
0x1156   :  { %v724_v46 = vpop.f32.mrf.mxu1 }
0x1157   :  { %v734_v47 = vadd.f32 %v730_v45, %v2025_v17  ;;  %v735_v48 = vadd.f32 %v731_v32, %v2027_v19 }
0x1158   :  { %v726_v49 = vpop.f32.mrf.mxu1 }
0x1159   :  { %1810 = vtanh.f32 %v734_v47 }
0x115a   :  { %1812 = vtanh.f32 %v735_v48  ;;  %v727_v51 = vpop.f32.mrf.mxu1 }
0x1166   :  { %v1811_v52 = vpop.eup %1810 }
0x1167   :  { %v1813_v53 = vpop.eup %1812  ;;  %v740_v54 = vrot.slane %v1811_v52, 3 }
0x1168   :  { %v741_v55 = vrot.slane %v1813_v53, 2 }
0x116a   :  { %v742_v56 = vsel %vm209_vm3, %v741_v55, %v740_v54 }
0x116b   :  { %v744_v57 = vmul.f32 %v742_v56, %v2033_v31 }
0x116d   :  { %v745_v58 = vadd.f32 %v744_v57, %v2035_v33 }
0x116f   :  { %752 = vrot.lane.b32.xlu1 %v745_v58, %s1919_s19  ;;  %v750_v63 = vmul.f32 %v748_v62, %v745_v58 }
0x11e1   :  { %v753_v59 = vpop.permute.xlu1 %752 }
0x11e2   :  { %v755_v61 = vmul.f32 %v753_v59, %v745_v58 }
0x11e4   :  { %757 = vrot.lane.b32.xlu1 %v755_v61, %s1923_s2 }
0x1256   :  { %v758_v7 = vpop.permute.xlu1 %757 }
0x1257   :  { %v760_v9 = vadd.f32 %v758_v7, %v750_v63 }
0x1259   :  { %1814 = vtanh.f32 %v760_v9 }
0x1266   :  { %v1815_v11 = vpop.eup %1814 }
0x1267   :  { %763 = vrot.lane.b32.xlu0 %v1815_v11, %s1919_s19 }
0x12d9   :  { %v764_v12 = vpop.permute.xlu0 %763 }
0x12da   :  { %v766_v13 = vmul.f32 %v764_v12, %v745_v58 }
0x12dc   :  { %v767_v14 = vpack.c.bf16 %v766_v13, %v766_v13 }
0x12de   :  { %769 = vrot.lane.b32.xlu1 %v767_v14, %s1923_s2 }
0x1350   :  { %v770_v15 = vpop.permute.xlu1 %769 }
0x1351   :  { %1707 = vmatmul.mubr.msk.bf16.vlgmr.msra.gmra.mxu0 %vm247_vm5, %v770_v15 }
0x1352   :  { %870 = vmatpush1.bf16.msra.mxu0 %v1990_v2  ;;  %893 = vmatprep.mubr.bf16.mxu0 %v1921_v0 }
0x1353   :  { %871 = vmatprep.subr.bf16.mxu0 %v1993_v3 }
0x1356   :  { %872 = vmatpush1.bf16.msra.mxu0 %v1996_v4 }
0x1357   :  { %873 = vmatprep.subr.bf16.mxu0 %v1999_v5 }
0x135a   :  { %874 = vmatpush1.bf16.msra.mxu0 %v2001_v6 }
0x135b   :  { %875 = vmatprep.subr.bf16.mxu0 %v2006_v8 }
0x135e   :  { %876 = vmatpush1.bf16.msra.mxu0 %v2014_v10 }
0x135f   :  { %1718 = vmatprep.subr.bf16.mxu0 %v1924_v43 }
0x1411   :  { %v808_v16 = vpop.f32.mrf.mxu0 }
0x1412   :  { %v809_v18 = vadd.f32 %v808_v16, %v724_v46 }
0x1413   :  { %v1708_v20 = vpop.f32.mrf.mxu0 }
0x1414   :  { %v814_v22 = vadd.f32 %v2081_v50, %v809_v18 }
0x1415   :  { %v811_v23 = vpop.f32.mrf.mxu0 }
0x1416   :  { %1816 = vtanh.f32 %v814_v22 }
0x1417   :  { %v1709_v25 = vpop.f32.mrf.mxu0 }
0x1423   :  { %v1817_v26 = vpop.eup %1816 }
0x1424   :  { %v816_v27 = vmul.f32 %v1817_v26, %v2033_v31 }
0x1426   :  { %v817_v29 = vadd.f32 %v816_v27, %v2035_v33 }
0x1428   :  { %820 = vrot.lane.b32.xlu0 %v817_v29, %s1919_s19  ;;  %v818_v35 = vmul.f32 %v817_v29, %v2200_v37 }
0x149a   :  { %v821_v30 = vpop.permute.xlu0 %820 }
0x149b   :  { %v823_v34 = vmul.f32 %v821_v30, %v817_v29 }
0x149d   :  { %825 = vrot.lane.b32.xlu1 %v823_v34, %s1923_s2 }
0x14a1   :  { %851 = vperm.xlu1 %1763, %v849_v21  }
0x150f   :  { %v826_v24 = vpop.permute.xlu1 %825 }
0x1510   :  { %v828_v36 = vadd.f32 %v826_v24, %v818_v35 }
0x1512   :  { %1818 = vtanh.f32 %v828_v36 }
0x151c   :  { %v852_v45 = vpop.permute.xlu1 %851 }
0x151d   :  { %vm853_vm14 = vcmp.eq.s32.totalorder %v852_v45, 1 }
0x151f   :  { %v1819_v38 = vpop.eup %1818 }
0x1520   :  { %831 = vrot.lane.b32.xlu0 %v1819_v38, %s1919_s19 }
0x1524   :  { %836 = vrot.lane.b32.xlu0 %v766_v13, %s1923_s2 }
0x1528   :  { %845 = vrot.lane.b32.xlu0 %v760_v9, %s1926_s14 }
0x1592   :  { %v832_v39 = vpop.permute.xlu0 %831 }
0x1593   :  { %v834_v41 = vmul.f32 %v832_v39, %v817_v29 }
0x1595   :  { %840 = vrot.lane.b32.xlu1 %v834_v41, %s1919_s19 }
0x1596   :  { %v837_v28 = vpop.permute.xlu0 %836 }
0x159a   :  { %v846_v32 = vpop.permute.xlu0 %845 }
0x159b   :  { %v848_v46 = vsel %vm247_vm5, %v846_v32, %v828_v36 }
0x159c   :  { %v2250_v47 = vsel %vm853_vm14, %v848_v46, %v2200_v37 }
0x159d   :  { %920 = vrot.lane.b32.xlu0 %v2250_v47, %s1923_s2 }
0x1607   :  { %v841_v48 = vpop.permute.xlu1 %840 }
0x1608   :  { %v843_v49 = vsel %vm247_vm5, %v837_v28, %v841_v48 }
0x1609   :  { %v2256_v51 = vsel %vm853_vm14, %v843_v49, %v2206_v40 }
0x160a   :  { %v857_v52 = vpack.c.bf16 %v2256_v51, %v2256_v51 }
0x160c   :  { %1639 = vmatmul.mubr.msk.bf16.vlgmr.msra.gmra.mxu0 %vm153_vm8, %v857_v52 }
0x160d   :  { %1719 = vmatpush3.bf16.msra.mxu0 %v2045_v42  ;;  %1722 = vmatprep.mubr.msk.bf16.mxu0 %vm1925_vm4, %v1924_v43 }
0x160e   :  { %1720 = vmatprep.subr.bf16.mxu0 %v1924_v43 }
0x160f   :  { %v921_v14 = vpop.permute.xlu0 %920 }
0x1611   :  { %1721 = vmatpush3.bf16.msra.mxu0 %v2054_v44 }
0x1612   :  { %1215 = vmatprep.subr.bf16.mxu0 %v1988_v1 }
0x16cc   :  { %v895_v37 = vpop.f32.mrf.mxu0 }
0x16cd   :  { %v903_v53 = vrot.slane %v895_v37, 4  ;;  %v904_v40 = vrot.slane %v895_v37, 5 }
0x16ce   :  { %v897_v54 = vpop.f32.mrf.mxu0 }
0x16cf   :  { %v907_v55 = vadd.f32 %v903_v53, %v2025_v17  ;;  %v908_v56 = vadd.f32 %v904_v40, %v2027_v19 }
0x16d0   :  { %v899_v57 = vpop.f32.mrf.mxu0 }
0x16d1   :  { %1820 = vtanh.f32 %v907_v55 }
0x16d2   :  { %1822 = vtanh.f32 %v908_v56  ;;  %v900_v58 = vpop.f32.mrf.mxu0 }
0x16de   :  { %v1821_v59 = vpop.eup %1820 }
0x16df   :  { %v1823_v61 = vpop.eup %1822  ;;  %v913_v62 = vrot.slane %v1821_v59, 4 }
0x16e0   :  { %v914_v63 = vrot.slane %v1823_v61, 3 }
0x16e2   :  { %v915_v7 = vsel %vm209_vm3, %v914_v63, %v913_v62 }
0x16e3   :  { %v917_v9 = vmul.f32 %v915_v7, %v2033_v31 }
0x16e5   :  { %v918_v11 = vadd.f32 %v917_v9, %v2035_v33 }
0x16e7   :  { %925 = vrot.lane.b32.xlu1 %v918_v11, %s1919_s19  ;;  %v923_v15 = vmul.f32 %v921_v14, %v918_v11 }
0x1759   :  { %v926_v12 = vpop.permute.xlu1 %925 }
0x175a   :  { %v928_v13 = vmul.f32 %v926_v12, %v918_v11 }
0x175c   :  { %930 = vrot.lane.b32.xlu1 %v928_v13, %s1923_s2 }
0x17ce   :  { %v931_v16 = vpop.permute.xlu1 %930 }
0x17cf   :  { %v933_v18 = vadd.f32 %v931_v16, %v923_v15 }
0x17d1   :  { %1824 = vtanh.f32 %v933_v18 }
0x17de   :  { %v1825_v20 = vpop.eup %1824 }
0x17df   :  { %936 = vrot.lane.b32.xlu0 %v1825_v20, %s1919_s19 }
0x1851   :  { %v937_v22 = vpop.permute.xlu0 %936 }
0x1852   :  { %v939_v23 = vmul.f32 %v937_v22, %v918_v11 }
0x1854   :  { %v940_v25 = vpack.c.bf16 %v939_v23, %v939_v23 }
0x1856   :  { %942 = vrot.lane.b32.xlu1 %v940_v25, %s1923_s2  ;;  %v2331_v25 = vld [vmem:[#allocation2 + $0x24] ss:$8 sps:$4 sm:$0xff]  }
0x18c8   :  { %v943_v26 = vpop.permute.xlu1 %942 }
0x18c9   :  { %1715 = vmatmul.mubr.msk.bf16.vlgmr.msra.gmra.mxu1 %vm247_vm5, %v943_v26  ;;  %v2334_v26 = vld [vmem:[#allocation2 + $0x20] ss:$8 sps:$4 sm:$0xff]  }
0x18ca   :  { %1043 = vmatpush1.bf16.msra.mxu1 %v1990_v2  ;;  %1066 = vmatprep.mubr.bf16.mxu1 %v1921_v0 }
0x18cb   :  { %1044 = vmatprep.subr.bf16.mxu1 %v1993_v3 }
0x18ce   :  { %1045 = vmatpush1.bf16.msra.mxu1 %v1996_v4 }
0x18cf   :  { %1046 = vmatprep.subr.bf16.mxu1 %v1999_v5 }
0x18d2   :  { %1047 = vmatpush1.bf16.msra.mxu1 %v2001_v6 }
0x18d3   :  { %1048 = vmatprep.subr.bf16.mxu1 %v2006_v8 }
0x18d6   :  { %1049 = vmatpush1.bf16.msra.mxu1 %v2014_v10  ;;  %v1022_v10 = vsel %vm856_vm15, 1, %v1921_v0 }
0x18d7   :  { %1726 = vmatprep.subr.bf16.mxu1 %v1924_v43 }
0x1989   :  { %v981_v27 = vpop.f32.mrf.mxu1 }
0x198a   :  { %v982_v29 = vadd.f32 %v981_v27, %v897_v54  ;;  %v2337_v27 = vld [vmem:[#allocation2 + $0x14] ss:$8 sps:$4 sm:$0xff]  }
0x198b   :  { %v1716_v30 = vpop.f32.mrf.mxu1 }
0x198c   :  { %v987_v2 = vadd.f32 %v2081_v50, %v982_v29  ;;  %v2340_v29 = vld [vmem:[#allocation2 + $0x10] ss:$8 sps:$4 sm:$0xff]   ;;  %v2343_v30 = vld [vmem:[#allocation2 + $0x4] ss:$8 sps:$4 sm:$0xff]  }
0x198d   :  { %v984_v34 = vpop.f32.mrf.mxu1 }
0x198e   :  { %1826 = vtanh.f32 %v987_v2  ;;  %v2346_v2 = vld [vmem:[#allocation2] ss:$8 sps:$4 sm:$0xff]  }
0x198f   :  { %v1717_v3 = vpop.f32.mrf.mxu1 }
0x199b   :  { %v1827_v21 = vpop.eup %1826 }
0x199c   :  { %v989_v4 = vmul.f32 %v1827_v21, %v2033_v31 }
0x199e   :  { %v990_v5 = vadd.f32 %v989_v4, %v2035_v33 }
0x19a0   :  { %993 = vrot.lane.b32.xlu0 %v990_v5, %s1919_s19  ;;  %v991_v35 = vmul.f32 %v990_v5, %v2250_v47 }
0x1a12   :  { %v994_v6 = vpop.permute.xlu0 %993 }
0x1a13   :  { %v996_v8 = vmul.f32 %v994_v6, %v990_v5 }
0x1a15   :  { %998 = vrot.lane.b32.xlu1 %v996_v8, %s1923_s2 }
0x1a19   :  { %1024 = vperm.xlu1 %1763, %v1022_v10  }
0x1a87   :  { %v999_v24 = vpop.permute.xlu1 %998 }
0x1a88   :  { %v1001_v36 = vadd.f32 %v999_v24, %v991_v35 }
0x1a8a   :  { %1828 = vtanh.f32 %v1001_v36 }
0x1a94   :  { %v1025_v45 = vpop.permute.xlu1 %1024 }
0x1a95   :  { %vm1026_vm0 = vcmp.eq.s32.totalorder %v1025_v45, 1 }
0x1a97   :  { %v1829_v38 = vpop.eup %1828 }
0x1a98   :  { %1004 = vrot.lane.b32.xlu0 %v1829_v38, %s1919_s19  ;;  %v1195_v38 = vsel %vm1029_vm1, 1, %v1921_v0 }
0x1a9c   :  { %1009 = vrot.lane.b32.xlu0 %v939_v23, %s1923_s2  ;;  %v2327_v23 = vld [vmem:[#allocation2 + $0x30] ss:$8 sps:$4 sm:$0xff]  }
0x1aa0   :  { %1018 = vrot.lane.b32.xlu0 %v933_v18, %s1926_s14 }
0x1b0a   :  { %v1005_v39 = vpop.permute.xlu0 %1004 }
0x1b0b   :  { %v1007_v41 = vmul.f32 %v1005_v39, %v990_v5 }
0x1b0d   :  { %1013 = vrot.lane.b32.xlu1 %v1007_v41, %s1919_s19 }
0x1b0e   :  { %v1010_v28 = vpop.permute.xlu0 %1009 }
0x1b12   :  { %v1019_v32 = vpop.permute.xlu0 %1018 }
0x1b13   :  { %v1021_v46 = vsel %vm247_vm5, %v1019_v32, %v1001_v36 }
0x1b14   :  { %v2300_v48 = vsel %vm1026_vm0, %v1021_v46, %v2250_v47 }
0x1b15   :  { %1093 = vrot.lane.b32.xlu0 %v2300_v48, %s1923_s2 }
0x1b7f   :  { %v1014_v49 = vpop.permute.xlu1 %1013 }
0x1b80   :  { %v1016_v52 = vsel %vm247_vm5, %v1010_v28, %v1014_v49 }
0x1b81   :  { %v2306_v37 = vsel %vm1026_vm0, %v1016_v52, %v2256_v51 }
0x1b82   :  { %v1030_v53 = vpack.c.bf16 %v2306_v37, %v2306_v37 }
0x1b84   :  { %1641 = vmatmul.mubr.msk.bf16.vlgmr.msra.gmra.mxu1 %vm153_vm8, %v1030_v53 }
0x1b85   :  { %1727 = vmatpush3.bf16.msra.mxu1 %v2045_v42  ;;  %1730 = vmatprep.mubr.msk.bf16.mxu1 %vm1925_vm4, %v1924_v43 }
0x1b86   :  { %1728 = vmatprep.subr.bf16.mxu1 %v1924_v43 }
0x1b87   :  { %v1094_v11 = vpop.permute.xlu0 %1093 }
0x1b89   :  { %1729 = vmatpush3.bf16.msra.mxu1 %v2054_v44 }
0x1b8a   :  { %1388 = vmatprep.subr.bf16.mxu1 %v1988_v1 }
0x1c44   :  { %v1068_v47 = vpop.f32.mrf.mxu1 }
0x1c45   :  { %v1076_v40 = vrot.slane %v1068_v47, 3  ;;  %v1077_v51 = vrot.slane %v1068_v47, 4 }
0x1c46   :  { %v1070_v54 = vpop.f32.mrf.mxu1 }
0x1c47   :  { %v1080_v55 = vadd.f32 %v1076_v40, %v2025_v17  ;;  %v1081_v56 = vadd.f32 %v1077_v51, %v2027_v19 }
0x1c48   :  { %v1072_v57 = vpop.f32.mrf.mxu1 }
0x1c49   :  { %1830 = vtanh.f32 %v1080_v55  ;;  %v1867_v55 = vld [vmem:[%s2473_s5 + $0x8] sm:$0xff]  }
0x1c4a   :  { %1832 = vtanh.f32 %v1081_v56  ;;  %v1073_v42 = vpop.f32.mrf.mxu1 }
0x1c56   :  { %v1831_v58 = vpop.eup %1830 }
0x1c57   :  { %v1833_v59 = vpop.eup %1832  ;;  %v1086_v61 = vrot.slane %v1831_v58, 5 }
0x1c58   :  { %v1087_v62 = vrot.slane %v1833_v59, 4 }
0x1c5a   :  { %v1088_v44 = vsel %vm209_vm3, %v1087_v62, %v1086_v61 }
0x1c5b   :  { %v1090_v1 = vmul.f32 %v1088_v44, %v2033_v31 }
0x1c5d   :  { %v1091_v63 = vadd.f32 %v1090_v1, %v2035_v33 }
0x1c5f   :  { %1098 = vrot.lane.b32.xlu1 %v1091_v63, %s1919_s19  ;;  %v1096_v12 = vmul.f32 %v1094_v11, %v1091_v63 }
0x1cd1   :  { %v1099_v7 = vpop.permute.xlu1 %1098 }
0x1cd2   :  { %v1101_v9 = vmul.f32 %v1099_v7, %v1091_v63 }
0x1cd4   :  { %1103 = vrot.lane.b32.xlu1 %v1101_v9, %s1923_s2 }
0x1d46   :  { %v1104_v13 = vpop.permute.xlu1 %1103 }
0x1d47   :  { %v1106_v14 = vadd.f32 %v1104_v13, %v1096_v12 }
0x1d49   :  { %1834 = vtanh.f32 %v1106_v14 }
0x1d56   :  { %v1835_v15 = vpop.eup %1834 }
0x1d57   :  { %1109 = vrot.lane.b32.xlu0 %v1835_v15, %s1919_s19 }
0x1dc9   :  { %v1110_v16 = vpop.permute.xlu0 %1109 }
0x1dca   :  { %v1112_v18 = vmul.f32 %v1110_v16, %v1091_v63 }
0x1dcc   :  { %v1113_v20 = vpack.c.bf16 %v1112_v18, %v1112_v18 }
0x1dce   :  { %1115 = vrot.lane.b32.xlu1 %v1113_v20, %s1923_s2 }
0x1e40   :  { %v1116_v22 = vpop.permute.xlu1 %1115 }
0x1e41   :  { %1723 = vmatmul.mubr.msk.bf16.vlgmr.msra.gmra.mxu0 %vm247_vm5, %v1116_v22 }
0x1e42   :  { %1216 = vmatpush1.bf16.msra.mxu0 %v2327_v23  ;;  %1239 = vmatprep.mubr.bf16.mxu0 %v1921_v0 }
0x1e43   :  { %1217 = vmatprep.subr.bf16.mxu0 %v2331_v25 }
0x1e46   :  { %1218 = vmatpush1.bf16.msra.mxu0 %v2334_v26 }
0x1e47   :  { %1219 = vmatprep.subr.bf16.mxu0 %v2337_v27 }
0x1e4a   :  { %1220 = vmatpush1.bf16.msra.mxu0 %v2340_v29 }
0x1e4b   :  { %1221 = vmatprep.subr.bf16.mxu0 %v2343_v30 }
0x1e4e   :  { %1222 = vmatpush1.bf16.msra.mxu0 %v2346_v2 }
0x1e4f   :  { %1734 = vmatprep.subr.bf16.mxu0 %v1924_v43 }
0x1f01   :  { %v1154_v34 = vpop.f32.mrf.mxu0 }
0x1f02   :  { %v1155_v3 = vadd.f32 %v1154_v34, %v1070_v54 }
0x1f03   :  { %v1724_v21 = vpop.f32.mrf.mxu0 }
0x1f04   :  { %v1160_v4 = vadd.f32 %v2081_v50, %v1155_v3 }
0x1f05   :  { %v1157_v5 = vpop.f32.mrf.mxu0 }
0x1f06   :  { %1836 = vtanh.f32 %v1160_v4 }
0x1f07   :  { %v1725_v6 = vpop.f32.mrf.mxu0 }
0x1f13   :  { %v1837_v8 = vpop.eup %1836 }
0x1f14   :  { %v1162_v10 = vmul.f32 %v1837_v8, %v2033_v31 }
0x1f16   :  { %v1163_v35 = vadd.f32 %v1162_v10, %v2035_v33 }
0x1f18   :  { %1166 = vrot.lane.b32.xlu0 %v1163_v35, %s1919_s19  ;;  %v1164_v50 = vmul.f32 %v1163_v35, %v2300_v48 }
0x1f8a   :  { %v1167_v24 = vpop.permute.xlu0 %1166 }
0x1f8b   :  { %v1169_v36 = vmul.f32 %v1167_v24, %v1163_v35  ;;  %v2415_v24 = vld [vmem:[%s2469_s1] sm:$0x3] }
0x1f8c   :  { %vm1202_vm6 = vcmp.gt.s32.totalorder %v2415_v24, 6 }
0x1f8d   :  { %1171 = vrot.lane.b32.xlu1 %v1169_v36, %s1923_s2  ;;  %v1368_v36 = vsel %vm1202_vm6, 1, %v1921_v0 }
0x1f91   :  { %1197 = vperm.xlu1 %1763, %v1195_v38  }
0x1fff   :  { %v1172_v39 = vpop.permute.xlu1 %1171 }
0x2000   :  { %v1174_v41 = vadd.f32 %v1172_v39, %v1164_v50 }
0x2002   :  { %1838 = vtanh.f32 %v1174_v41 }
0x200c   :  { %v1198_v46 = vpop.permute.xlu1 %1197 }
0x200d   :  { %vm1199_vm2 = vcmp.eq.s32.totalorder %v1198_v46, 1 }
0x200f   :  { %v1839_v28 = vpop.eup %1838 }
0x2010   :  { %1177 = vrot.lane.b32.xlu0 %v1839_v28, %s1919_s19 }
0x2014   :  { %1182 = vrot.lane.b32.xlu0 %v1112_v18, %s1923_s2 }
0x2018   :  { %1191 = vrot.lane.b32.xlu0 %v1106_v14, %s1926_s14 }
0x2082   :  { %v1178_v45 = vpop.permute.xlu0 %1177 }
0x2083   :  { %v1180_v32 = vmul.f32 %v1178_v45, %v1163_v35 }
0x2085   :  { %1186 = vrot.lane.b32.xlu1 %v1180_v32, %s1919_s19 }
0x2086   :  { %v1183_v60 = vpop.permute.xlu0 %1182 }
0x208a   :  { %v1192_v49 = vpop.permute.xlu0 %1191 }
0x208b   :  { %v1194_v52 = vsel %vm247_vm5, %v1192_v49, %v1174_v41 }
0x208c   :  { %v2364_v53 = vsel %vm1199_vm2, %v1194_v52, %v2300_v48  ;;  %v1868_v48 = vld [vmem:[%s2473_s5] sm:$0xff]  }
0x208d   :  { %1266 = vrot.lane.b32.xlu0 %v2364_v53, %s1923_s2 }
0x20f7   :  { %v1187_v47 = vpop.permute.xlu1 %1186 }
0x20f8   :  { %v1189_v40 = vsel %vm247_vm5, %v1183_v60, %v1187_v47 }
0x20f9   :  { %v2370_v51 = vsel %vm1199_vm2, %v1189_v40, %v2306_v37 }
0x20fa   :  { %v1203_v54 = vpack.c.bf16 %v2370_v51, %v2370_v51 }
0x20fc   :  { %1643 = vmatmul.mubr.msk.bf16.vlgmr.msra.gmra.mxu0 %vm153_vm8, %v1203_v54 }
0x20fd   :  { %1735 = vmatpush3.bf16.msra.mxu0 %v1867_v55  ;;  %1738 = vmatprep.mubr.msk.bf16.mxu0 %vm1925_vm4, %v1924_v43 }
0x20fe   :  { %1736 = vmatprep.subr.bf16.mxu0 %v1924_v43 }
0x20ff   :  { %v1267_v15 = vpop.permute.xlu0 %1266 }
0x2101   :  { %1737 = vmatpush3.bf16.msra.mxu0 %v1868_v48 }
0x2102   :  { %1742 = vmatprep.subr.bf16.mxu0 %v1924_v43 }
0x21bc   :  { %v1241_v37 = vpop.f32.mrf.mxu0 }
0x21bd   :  { %v1249_v56 = vrot.slane %v1241_v37, 2  ;;  %v1250_v57 = vrot.slane %v1241_v37, 3 }
0x21be   :  { %v1243_v42 = vpop.f32.mrf.mxu0 }
0x21bf   :  { %v1253_v58 = vadd.f32 %v1249_v56, %v2025_v17  ;;  %v1254_v59 = vadd.f32 %v1250_v57, %v2027_v19 }
0x21c0   :  { %v1245_v61 = vpop.f32.mrf.mxu0 }
0x21c1   :  { %1840 = vtanh.f32 %v1253_v58 }
0x21c2   :  { %1842 = vtanh.f32 %v1254_v59  ;;  %v1246_v62 = vpop.f32.mrf.mxu0 }
0x21ce   :  { %v1841_v44 = vpop.eup %1840 }
0x21cf   :  { %v1843_v1 = vpop.eup %1842  ;;  %v1259_v63 = vrot.slane %v1841_v44, 6 }
0x21d0   :  { %v1260_v7 = vrot.slane %v1843_v1, 5 }
0x21d2   :  { %v1261_v9 = vsel %vm209_vm3, %v1260_v7, %v1259_v63 }
0x21d3   :  { %v1263_v11 = vmul.f32 %v1261_v9, %v2033_v31 }
0x21d5   :  { %v1264_v12 = vadd.f32 %v1263_v11, %v2035_v33 }
0x21d7   :  { %1271 = vrot.lane.b32.xlu1 %v1264_v12, %s1919_s19  ;;  %v1269_v16 = vmul.f32 %v1267_v15, %v1264_v12 }
0x2249   :  { %v1272_v13 = vpop.permute.xlu1 %1271 }
0x224a   :  { %v1274_v14 = vmul.f32 %v1272_v13, %v1264_v12 }
0x224c   :  { %1276 = vrot.lane.b32.xlu1 %v1274_v14, %s1923_s2 }
0x22be   :  { %v1277_v18 = vpop.permute.xlu1 %1276 }
0x22bf   :  { %v1279_v20 = vadd.f32 %v1277_v18, %v1269_v16 }
0x22c1   :  { %1844 = vtanh.f32 %v1279_v20 }
0x22ce   :  { %v1845_v22 = vpop.eup %1844 }
0x22cf   :  { %1282 = vrot.lane.b32.xlu0 %v1845_v22, %s1919_s19 }
0x2341   :  { %v1283_v34 = vpop.permute.xlu0 %1282 }
0x2342   :  { %v1285_v3 = vmul.f32 %v1283_v34, %v1264_v12 }
0x2344   :  { %v1286_v21 = vpack.c.bf16 %v1285_v3, %v1285_v3 }
0x2346   :  { %1288 = vrot.lane.b32.xlu1 %v1286_v21, %s1923_s2 }
0x23b8   :  { %v1289_v4 = vpop.permute.xlu1 %1288 }
0x23b9   :  { %1731 = vmatmul.mubr.msk.bf16.vlgmr.msra.gmra.mxu1 %vm247_vm5, %v1289_v4 }
0x23ba   :  { %1389 = vmatpush1.bf16.msra.mxu1 %v2327_v23  ;;  %1412 = vmatprep.mubr.bf16.mxu1 %v1921_v0  ;;  %v2406_v23 = vld [vmem:[%s2474_s6] ss:$0 sm:$0xff] }
0x23bb   :  { %1390 = vmatprep.subr.bf16.mxu1 %v2331_v25 }
0x23be   :  { %1391 = vmatpush1.bf16.msra.mxu1 %v2334_v26 }
0x23bf   :  { %1392 = vmatprep.subr.bf16.mxu1 %v2337_v27 }
0x23c2   :  { %1393 = vmatpush1.bf16.msra.mxu1 %v2340_v29 }
0x23c3   :  { %1394 = vmatprep.subr.bf16.mxu1 %v2343_v30 }
0x23c6   :  { %1395 = vmatpush1.bf16.msra.mxu1 %v2346_v2 }
0x2479   :  { %v1327_v5 = vpop.f32.mrf.mxu1 }
0x247a   :  { %v1328_v6 = vadd.f32 %v1327_v5, %v1243_v42 }
0x247b   :  { %v1732_v8 = vpop.f32.mrf.mxu1 }
0x247c   :  { %v1333_v25 = vadd.f32 %v2406_v23, %v1328_v6 }
0x247d   :  { %v1330_v10 = vpop.f32.mrf.mxu1 }
0x247e   :  { %1846 = vtanh.f32 %v1333_v25 }
0x247f   :  { %v1733_v26 = vpop.f32.mrf.mxu1 }
0x248b   :  { %v1847_v27 = vpop.eup %1846 }
0x248c   :  { %v1335_v29 = vmul.f32 %v1847_v27, %v2033_v31 }
0x248e   :  { %v1336_v30 = vadd.f32 %v1335_v29, %v2035_v33 }
0x2490   :  { %1339 = vrot.lane.b32.xlu0 %v1336_v30, %s1919_s19  ;;  %v1337_v38 = vmul.f32 %v1336_v30, %v2364_v53 }
0x2502   :  { %v1340_v2 = vpop.permute.xlu0 %1339 }
0x2503   :  { %v1342_v35 = vmul.f32 %v1340_v2, %v1336_v30 }
0x2505   :  { %1344 = vrot.lane.b32.xlu1 %v1342_v35, %s1923_s2 }
0x2509   :  { %1370 = vperm.xlu1 %1763, %v1368_v36  }
0x2577   :  { %v1345_v50 = vpop.permute.xlu1 %1344 }
0x2578   :  { %v1347_v39 = vadd.f32 %v1345_v50, %v1337_v38 }
0x257a   :  { %1848 = vtanh.f32 %v1347_v39 }
0x2584   :  { %v1371_v60 = vpop.permute.xlu1 %1370 }
0x2585   :  { %vm1372_vm7 = vcmp.eq.s32.totalorder %v1371_v60, 1 }
0x2587   :  { %v1849_v41 = vpop.eup %1848 }
0x2588   :  { %1350 = vrot.lane.b32.xlu0 %v1849_v41, %s1919_s19 }
0x258c   :  { %1355 = vrot.lane.b32.xlu0 %v1285_v3, %s1923_s2 }
0x2590   :  { %1364 = vrot.lane.b32.xlu0 %v1279_v20, %s1926_s14 }
0x25fa   :  { %v1351_v28 = vpop.permute.xlu0 %1350 }
0x25fb   :  { %v1353_v45 = vmul.f32 %v1351_v28, %v1336_v30 }
0x25fd   :  { %1359 = vrot.lane.b32.xlu1 %v1353_v45, %s1919_s19 }
0x25fe   :  { %v1356_v32 = vpop.permute.xlu0 %1355 }
0x2602   :  { %v1365_v46 = vpop.permute.xlu0 %1364 }
0x2603   :  { %v1367_v49 = vsel %vm247_vm5, %v1365_v46, %v1347_v39 }
0x2604   :  { %v1374_v52 = vsel %vm1372_vm7, %v1367_v49, %v2364_v53 }
0x2605   :  { %1439 = vrot.lane.b32.xlu0 %v1374_v52, %s1923_s2 }
0x266f   :  { %v1360_v47 = vpop.permute.xlu1 %1359 }
0x2670   :  { %v1362_v40 = vsel %vm247_vm5, %v1356_v32, %v1360_v47 }
0x2671   :  { %v2430_v54 = vsel %vm1372_vm7, %v1362_v40, %v2370_v51 }
0x2672   :  { %v1376_v55 = vpack.c.bf16 %v2430_v54, %v2430_v54 }
0x2674   :  { %1645 = vmatmul.mubr.msk.bf16.vlgmr.msra.gmra.mxu1 %vm153_vm8, %v1376_v55 }
0x2734   :  { %v1414_v48 = vpop.f32.mrf.mxu1 }
0x2735   :  { %v1422_v37 = vrot.slane %v1414_v48, 1  ;;  %v1423_v56 = vrot.slane %v1414_v48, 2 }
0x2736   :  { %v1416_v57 = vpop.f32.mrf.mxu1 }
0x2737   :  { %v1426_v42 = vadd.f32 %v1422_v37, %v2025_v17  ;;  %v1427_v53 = vadd.f32 %v1423_v56, %v2027_v19  ;;  %v1440_v19 = vpop.permute.xlu0 %1439 }
0x2738   :  { %v1418_v58 = vpop.f32.mrf.mxu1 }
0x2739   :  { %1850 = vtanh.f32 %v1426_v42 }
0x273a   :  { %1852 = vtanh.f32 %v1427_v53  ;;  %v1419_v59 = vpop.f32.mrf.mxu1 }
0x2746   :  { %v1851_v61 = vpop.eup %1850 }
0x2747   :  { %v1853_v51 = vpop.eup %1852  ;;  %v1432_v62 = vrot.slane %v1851_v61, 7 }
0x2748   :  { %v1433_v44 = vrot.slane %v1853_v51, 6 }
0x274a   :  { %v1434_v1 = vsel %vm209_vm3, %v1433_v44, %v1432_v62  ;;  %vm1375_vm3 = vcmp.gt.s32.totalorder %v2415_v24, 7 }
0x274b   :  { %v1436_v63 = vmul.f32 %v1434_v1, %v2033_v31  ;;  %v1536_v27 = vsel %vm1375_vm3, 1, %v1921_v0 }
0x274d   :  { %v1437_v7 = vadd.f32 %v1436_v63, %v2035_v33 }
0x274f   :  { %1444 = vrot.lane.b32.xlu1 %v1437_v7, %s1919_s19  ;;  %v1442_v11 = vmul.f32 %v1440_v19, %v1437_v7 }
0x27c1   :  { %v1445_v9 = vpop.permute.xlu1 %1444 }
0x27c2   :  { %v1447_v17 = vmul.f32 %v1445_v9, %v1437_v7 }
0x27c4   :  { %1449 = vrot.lane.b32.xlu1 %v1447_v17, %s1923_s2 }
0x2836   :  { %v1450_v12 = vpop.permute.xlu1 %1449 }
0x2837   :  { %v1452_v13 = vadd.f32 %v1450_v12, %v1442_v11 }
0x2839   :  { %1854 = vtanh.f32 %v1452_v13 }
0x2846   :  { %v1855_v14 = vpop.eup %1854 }
0x2847   :  { %1455 = vrot.lane.b32.xlu0 %v1855_v14, %s1919_s19 }
0x28b9   :  { %v1456_v15 = vpop.permute.xlu0 %1455 }
0x28ba   :  { %v1458_v16 = vmul.f32 %v1456_v15, %v1437_v7 }
0x28bc   :  { %v1459_v18 = vpack.c.bf16 %v1458_v16, %v1458_v16 }
0x28be   :  { %1461 = vrot.lane.b32.xlu1 %v1459_v18, %s1923_s2 }
0x2930   :  { %v1462_v20 = vpop.permute.xlu1 %1461 }
0x2931   :  { %1739 = vmatmul.mubr.msk.bf16.vlgmr.msra.gmra.mxu0 %vm247_vm5, %v1462_v20 }
0x2932   :  { %1746 = vmatprep.mubr.msk.bf16.mxu0 %vm1925_vm4, %v1924_v43 }
0x29f1   :  { %v1500_v22 = vpop.f32.mrf.mxu0 }
0x29f2   :  { %v1501_v34 = vadd.f32 %v1500_v22, %v1416_v57 }
0x29f3   :  { %v1740_v3 = vpop.f32.mrf.mxu0 }
0x29f4   :  { %v1506_v21 = vadd.f32 %v2406_v23, %v1501_v34 }
0x29f5   :  { %v1503_v4 = vpop.f32.mrf.mxu0 }
0x29f6   :  { %1856 = vtanh.f32 %v1506_v21 }
0x29f7   :  { %v1741_v5 = vpop.f32.mrf.mxu0 }
0x2a03   :  { %v1857_v6 = vpop.eup %1856 }
0x2a04   :  { %v1508_v8 = vmul.f32 %v1857_v6, %v2033_v31  ;;  %v1778_v31 = vld [vmem:[#allocation4 + $0x8] sm:$0xff]  }
0x2a05   :  { %1743 = vmatpush3.bf16.msra.mxu0 %v1778_v31 }
0x2a06   :  { %v1509_v25 = vadd.f32 %v1508_v8, %v2035_v33  ;;  %v1779_v33 = vld [vmem:[#allocation4] sm:$0xff]   ;;  %1744 = vmatprep.subr.bf16.mxu0 %v1924_v43 }
0x2a07   :  { %v1647_v43 = vld [vmem:[%s2476_s8] ss:$0 sm:$0xff] }
0x2a08   :  { %1512 = vrot.lane.b32.xlu0 %v1509_v25, %s1919_s19  ;;  %v1510_v23 = vmul.f32 %v1509_v25, %v1374_v52 }
0x2a09   :  { %1745 = vmatpush3.bf16.msra.mxu0 %v1779_v33 }
0x2a7a   :  { %v1513_v10 = vpop.permute.xlu0 %1512 }
0x2a7b   :  { %v1515_v26 = vmul.f32 %v1513_v10, %v1509_v25 }
0x2a7d   :  { %1517 = vrot.lane.b32.xlu1 %v1515_v26, %s1923_s2 }
0x2a81   :  { %1538 = vperm.xlu1 %1763, %v1536_v27  }
0x2aef   :  { %v1518_v29 = vpop.permute.xlu1 %1517 }
0x2af0   :  { %v1520_v30 = vadd.f32 %v1518_v29, %v1510_v23 }
0x2af2   :  { %1858 = vtanh.f32 %v1520_v30 }
0x2afc   :  { %v1539_v0 = vpop.permute.xlu1 %1538 }
0x2afd   :  { %vm1540_vm4 = vcmp.eq.s32.totalorder %v1539_v0, 1 }
0x2aff   :  { %v1859_v2 = vpop.eup %1858 }
0x2b00   :  { %1523 = vrot.lane.b32.xlu0 %v1859_v2, %s1919_s19 }
0x2b04   :  { %1528 = vrot.lane.b32.xlu0 %v1458_v16, %s1923_s2 }
0x2b72   :  { %v1524_v35 = vpop.permute.xlu0 %1523 }
0x2b73   :  { %v1526_v24 = vmul.f32 %v1524_v35, %v1509_v25 }
0x2b75   :  { %1532 = vrot.lane.b32.xlu1 %v1526_v24, %s1919_s19 }
0x2b76   :  { %v1529_v36 = vpop.permute.xlu0 %1528 }
0x2be7   :  { %v1533_v38 = vpop.permute.xlu1 %1532 }
0x2be8   :  { %v1535_v50 = vsel %vm247_vm5, %v1529_v36, %v1533_v38 }
0x2be9   :  { %v1541_v39 = vsel %vm1540_vm4, %v1535_v50, %v2430_v54 }
0x2bea   :  { %v1542_v41 = vpack.c.bf16 %v1541_v39, %v1541_v39 }
0x2bec   :  { %1555 = vrot.lane.b32.xlu0 %v1542_v41, %s1926_s14 }
0x2c5e   :  { %v1556_v28 = vpop.permute.xlu0 %1555 }
0x2c5f   :  { %1747 = vmatmul.mubr.msk.bf16.vlgmr.msra.gmra.mxu0 %vm247_vm5, %v1556_v28 }
0x2d1f   :  { %v1606_v45 = vpop.f32.mrf.mxu0 }
0x2d20   :  { %v1607_v32 = vadd.f32 %v1647_v43, %v1606_v45 }
0x2d21   :  { %v1748_v60 = vpop.f32.mrf.mxu0 }
0x2d22   :  { %1612 = vst [vmem:[%s2477_s9] sm:$0x3] %v1607_v32 }
0x2d23   :  { %v1609_v46 = vpop.f32.mrf.mxu0 }
0x2d25   :  { %v1749_v49 = vpop.f32.mrf.mxu0 }
0x2d26   :  { %1617 = vsyncpa [#allocation3], 1 }
0x2d27   :  { %1618 = vsyncpa [#allocation5], 1 }

</bundles_post_ra>
